<compile_context>
chip_gen: v5e
topology: v5e:2x2
jax: 0.10.0
libtpu: 0.0.40
codegen_flags: <defaults>
</compile_context>

<pallas_src>
import jax
import jax.numpy as jnp
from jax.experimental import pallas as pl
from jax.experimental.pallas import tpu as pltpu

# ---------------- hyper-parameters (small, shape-consistent) -----------------
NZ    = 16            # hp.Nz
M     = 4             # hp.M  (GMM mixture components)
H     = 32            # hp.dec_hidden_size
N_MAX = 7             # N_max  -> len_out = N_MAX + 1 in training mode
B     = 2             # real batch
BP    = 8             # batch padded to the f32 sublane tile
SEQ   = N_MAX + 1     # sequence length fed to the LSTM
IN    = NZ + 5        # LSTM input feature size (21)
INP   = 24            # padded input width (col IN is the ones/bias column)
NP    = 6 * M + 3     # real fc_params output columns (27)
OUT_W = 128           # lane-dense slab width (== 4*H)

# packed-parameter blob row offsets (all 8-row aligned)
R_WHC = 0             # rows [0,24):  fc_hc weight (NZ rows) + bias row NZ
R_WIH = 24            # rows [24,48): W_ih (IN rows, gate-scaled) + fused bias row IN
R_WHH = 48            # rows [48,80): W_hh (H rows, gate-scaled)
R_WP  = 80            # rows [80,112): fc_params weight (H rows, col-permuted, lane-padded)
R_BP  = 112           # rows [112,120): fc_params bias (row 112)
PROWS = 120


# ------------------------------- Pallas kernel -------------------------------
def decoder_kernel(data_ref, p_ref, slab_ref):
    f32 = jnp.float32

    x  = data_ref[0:SEQ * BP, :]              # (64, 24)  x with ones col @ IN
    zb = data_ref[SEQ * BP:SEQ * BP + BP, :]  # (8, 24)   z with ones col @ NZ

    whc = p_ref[R_WHC:R_WHC + INP, :]         # (24, 128)
    wih = p_ref[R_WIH:R_WIH + INP, :]         # (24, 128)
    whh = p_ref[R_WHH:R_WHH + H, :]           # (32, 128)
    wp  = p_ref[R_WP:R_WP + H, :]             # (32, 128)
    bpr = p_ref[R_BP:R_BP + 1, :]             # (1, 128)

    # hidden_cell is None -> (h, c) = split(tanh(fc_hc(z)), H, dim=1); bias folded.
    hc = jnp.tanh(jnp.dot(zb, whc, preferred_element_type=f32))     # (8, 128)
    h = hc[:, 0:H]
    c = hc[:, H:2 * H]

    # Hoisted input projection for ALL timesteps (LSTM biases folded in).
    xp = jnp.dot(x, wih, preferred_element_type=f32)                # (64, 128)

    # Gate post-affine constants (hoisted; pre-scale 0.5 on i/f/o already folded
    # into wih/whh/bias so sigmoid(x) == 0.5*tanh(x/2) + 0.5 needs one tanh).
    lane = jax.lax.broadcasted_iota(jnp.int32, (BP, 4 * H), 1)
    is_g = (lane >= 2 * H) & (lane < 3 * H)
    post_scale = jnp.where(is_g, 1.0, 0.5).astype(f32)
    post_shift = jnp.where(is_g, 0.0, 0.5).astype(f32)

    # Static unroll over SEQ = 8; hidden states stay in vregs.
    hs = []
    for t in range(SEQ):
        pre = xp[t * BP:(t + 1) * BP, :] + jnp.dot(
            h, whh, preferred_element_type=f32)                     # (8, 128)
        act = jnp.tanh(pre) * post_scale + post_shift
        i_g = act[:, 0 * H:1 * H]
        f_g = act[:, 1 * H:2 * H]
        g_g = act[:, 2 * H:3 * H]
        o_g = act[:, 3 * H:4 * H]
        c = f_g * c + i_g * g_g
        h = o_g * jnp.tanh(c)
        hs.append(h)

    # fc_params once over every timestep's output (training-mode forward).
    h_all = jnp.concatenate(hs, axis=0)                             # (64, 32)
    y = jnp.dot(h_all, wp, preferred_element_type=f32) + bpr        # (64, 128)

    # Column layout: [0:M) pi | [M:2M) mu_x | [2M:3M) mu_y | [3M:4M) sigma_x |
    #                [4M:5M) sigma_y | [5M:6M) rho_xy | [6M:NP) q | rest pad.
    col = jax.lax.broadcasted_iota(jnp.int32, y.shape, 1)
    pi_mask   = col < M
    exp_mask  = (col >= 3 * M) & (col < 5 * M)
    tanh_mask = (col >= 5 * M) & (col < 6 * M)
    q_mask    = (col >= 6 * M) & (col < NP)
    pad_mask  = col >= NP
    NEG = jnp.float32(-1e30)

    # Segmented softmax over the pi and q lane groups (masked before exp).
    pi_y = jnp.where(pi_mask, y, NEG)
    pi_e = jnp.where(pi_mask,
                     jnp.exp(pi_y - jnp.max(pi_y, axis=-1, keepdims=True)), 0.0)
    pi_v = pi_e / jnp.sum(pi_e, axis=-1, keepdims=True)

    q_y = jnp.where(q_mask, y, NEG)
    q_e = jnp.where(q_mask,
                    jnp.exp(q_y - jnp.max(q_y, axis=-1, keepdims=True)), 0.0)
    q_v = q_e / jnp.sum(q_e, axis=-1, keepdims=True)

    out = y                                        # identity: mu_x / mu_y
    out = jnp.where(exp_mask, jnp.exp(y), out)     # sigma_x / sigma_y
    out = jnp.where(tanh_mask, jnp.tanh(y), out)   # rho_xy
    out = jnp.where(pi_mask, pi_v, out)            # pi softmax
    out = jnp.where(q_mask, q_v, out)              # q softmax
    out = jnp.where(pad_mask, 0.0, out)            # keep padding clean

    # Final (h, c) ride in the last BP rows of the slab -> single dense store.
    hc_tail = jnp.concatenate(
        [h, c, jnp.zeros((BP, OUT_W - 2 * H), f32)], axis=1)        # (8, 128)
    slab_ref[...] = jnp.concatenate([out, hc_tail], axis=0)         # (72, 128)


# ------------------------------ wrapper (glue) --------------------------------
def _vmem_spec():
    return pl.BlockSpec(memory_space=pltpu.MemorySpace.VMEM)


@jax.jit
def decoder_forward(inputs, z, pblob):
    # Pack (x, z) into one padded data blob: ones column folds the biases in.
    x_p = jnp.zeros((SEQ, BP, INP), jnp.float32)
    x_p = x_p.at[:, :B, :IN].set(inputs)
    x_p = x_p.at[:, :, IN].set(1.0)
    z_p = jnp.zeros((BP, INP), jnp.float32)
    z_p = z_p.at[:B, :NZ].set(z)
    z_p = z_p.at[:, NZ].set(1.0)
    data = jnp.concatenate([x_p.reshape(SEQ * BP, INP), z_p], axis=0)   # (72, 24)

    slab = pl.pallas_call(
        decoder_kernel,
        out_shape=jax.ShapeDtypeStruct((SEQ * BP + BP, OUT_W), jnp.float32),
        in_specs=[_vmem_spec(), _vmem_spec()],
        out_specs=_vmem_spec(),
    )(data, pblob)

    body = slab[:SEQ * BP].reshape(SEQ, BP, OUT_W)[:, :B, :]
    pi  = body[..., 0 * M:1 * M]
    mux = body[..., 1 * M:2 * M]
    muy = body[..., 2 * M:3 * M]
    sx  = body[..., 3 * M:4 * M]
    sy  = body[..., 4 * M:5 * M]
    rho = body[..., 5 * M:6 * M]
    q   = body[..., 6 * M:NP]
    tail = slab[SEQ * BP:SEQ * BP + B]
    h_fin = tail[:, 0:H][None]
    c_fin = tail[:, H:2 * H][None]
    return pi, mux, muy, sx, sy, rho, q, h_fin, c_fin


# --------------------- deterministic parameter construction -------------------
def init_params(key):
    ks = jax.random.split(key, 8)

    def u(k, shape, fan_in):
        b = 1.0 / (fan_in ** 0.5)
        return jax.random.uniform(k, shape, jnp.float32, -b, b)

    # PyTorch-layout parameters (used by the pure-JAX reference).
    w_hc = u(ks[0], (2 * H, NZ), NZ)
    b_hc = u(ks[1], (2 * H,), NZ)
    w_ih = u(ks[2], (4 * H, IN), H)
    b_ih = u(ks[3], (4 * H,), H)
    w_hh = u(ks[4], (4 * H, H), H)
    b_hh = u(ks[5], (4 * H,), H)
    w_p  = u(ks[6], (NP, H), H)
    b_p  = u(ks[7], (NP,), H)
    raw = (w_hc, b_hc, w_ih, b_ih, w_hh, b_hh, w_p, b_p)

    # Gate pre-scale: sigmoid(x) = 0.5*tanh(x/2) + 0.5 -> fold the 0.5 into the
    # i/f/o gate columns of W_ih / W_hh / fused bias.
    lane = jnp.arange(4 * H)
    gsc = jnp.where((lane >= 2 * H) & (lane < 3 * H), 1.0, 0.5).astype(jnp.float32)

    # fc_params columns reordered so the slab is [pi|mu_x|mu_y|sx|sy|rho|q].
    perm = jnp.array([6 * m + j for j in range(6) for m in range(M)]
                     + [6 * M, 6 * M + 1, 6 * M + 2], dtype=jnp.int32)

    # Single packed, pre-padded parameter blob.
    P = jnp.zeros((PROWS, OUT_W), jnp.float32)
    P = P.at[R_WHC:R_WHC + NZ, 0:2 * H].set(w_hc.T)                 # fc_hc W
    P = P.at[R_WHC + NZ, 0:2 * H].set(b_hc)                         # fc_hc b
    P = P.at[R_WIH:R_WIH + IN, :].set(w_ih.T * gsc[None, :])        # W_ih (scaled)
    P = P.at[R_WIH + IN, :].set((b_ih + b_hh) * gsc)                # fused bias
    P = P.at[R_WHH:R_WHH + H, :].set(w_hh.T * gsc[None, :])         # W_hh (scaled)
    P = P.at[R_WP:R_WP + H, 0:NP].set(w_p.T[:, perm])               # fc_params W
    P = P.at[R_BP, 0:NP].set(b_p[perm])                             # fc_params b
    return raw, P


# ------------------------------ pure-JAX reference ----------------------------
def reference_forward(inputs, z, raw):
    w_hc, b_hc, w_ih, b_ih, w_hh, b_hh, w_p, b_p = raw
    hc = jnp.tanh(jnp.dot(z, w_hc.T) + b_hc)
    h0, c0 = hc[:, :H], hc[:, H:]

    def step(carry, x_t):
        h, c = carry
        gates = jnp.dot(x_t, w_ih.T) + b_ih + jnp.dot(h, w_hh.T) + b_hh
        i = jax.nn.sigmoid(gates[:, :H])
        f = jax.nn.sigmoid(gates[:, H:2 * H])
        g = jnp.tanh(gates[:, 2 * H:3 * H])
        o = jax.nn.sigmoid(gates[:, 3 * H:])
        c_new = f * c + i * g
        h_new = o * jnp.tanh(c_new)
        return (h_new, c_new), h_new

    (h_fin, c_fin), outs = jax.lax.scan(step, (h0, c0), inputs)
    y = jnp.dot(outs.reshape(-1, H), w_p.T) + b_p
    mix = y[:, :6 * M].reshape(-1, M, 6)
    pi  = jax.nn.softmax(mix[:, :, 0], axis=-1).reshape(SEQ, B, M)
    mux = mix[:, :, 1].reshape(SEQ, B, M)
    muy = mix[:, :, 2].reshape(SEQ, B, M)
    sx  = jnp.exp(mix[:, :, 3]).reshape(SEQ, B, M)
    sy  = jnp.exp(mix[:, :, 4]).reshape(SEQ, B, M)
    rho = jnp.tanh(mix[:, :, 5]).reshape(SEQ, B, M)
    q   = jax.nn.softmax(y[:, 6 * M:], axis=-1).reshape(SEQ, B, 3)
    return pi, mux, muy, sx, sy, rho, q, h_fin[None], c_fin[None]


# ------------------------------------ main ------------------------------------
if __name__ == "__main__":
    key = jax.random.PRNGKey(0)
    k_in, k_z, k_p = jax.random.split(key, 3)

    inputs = jax.random.normal(k_in, (SEQ, B, IN), jnp.float32)
    z      = jax.random.normal(k_z, (B, NZ), jnp.float32)
    raw, pblob = init_params(k_p)

    outs = jax.block_until_ready(decoder_forward(inputs, z, pblob))

    with jax.default_matmul_precision("highest"):
        refs = jax.block_until_ready(reference_forward(inputs, z, raw))

    for o, r in zip(outs, refs):
        assert o.shape == r.shape and o.dtype == r.dtype
        assert jnp.allclose(o, r, rtol=2e-2, atol=2e-2)

    # TODO(synk): nn.LSTM's `dropout=hp.dropout` is a no-op for a 1-layer LSTM
    # and is not modeled; the eval-mode branch (fc_params on final hidden only)
    # is not implemented -- this kernel reproduces the training-mode forward.
    print("KERNEL_OK")
</pallas_src>

<mosaic_0001>
module attributes {stable_mosaic.version = 11 : i64} {
  func.func @decoder_kernel(%arg0: memref<72x24xf32, #tpu.memory_space<vmem>>, %arg1: memref<120x128xf32, #tpu.memory_space<vmem>>, %arg2: memref<72x128xf32, #tpu.memory_space<vmem>>) attributes {dimension_semantics = [], scalar_prefetch = 0 : i64, scratch_operands = 0 : i64, tpu.core_type = #tpu.core_type<tc>} {
    %c0 = arith.constant 0 : index
    %c0_0 = arith.constant 0 : index
    %0 = vector.load %arg0[%c0, %c0_0] : memref<72x24xf32, #tpu.memory_space<vmem>>, vector<64x24xf32>
    %c64 = arith.constant 64 : index
    %c0_1 = arith.constant 0 : index
    %1 = vector.load %arg0[%c64, %c0_1] : memref<72x24xf32, #tpu.memory_space<vmem>>, vector<8x24xf32>
    %c0_2 = arith.constant 0 : index
    %c0_3 = arith.constant 0 : index
    %2 = vector.load %arg1[%c0_2, %c0_3] : memref<120x128xf32, #tpu.memory_space<vmem>>, vector<24x128xf32>
    %c24 = arith.constant 24 : index
    %c0_4 = arith.constant 0 : index
    %3 = vector.load %arg1[%c24, %c0_4] : memref<120x128xf32, #tpu.memory_space<vmem>>, vector<24x128xf32>
    %c48 = arith.constant 48 : index
    %c0_5 = arith.constant 0 : index
    %4 = vector.load %arg1[%c48, %c0_5] : memref<120x128xf32, #tpu.memory_space<vmem>>, vector<32x128xf32>
    %c80 = arith.constant 80 : index
    %c0_6 = arith.constant 0 : index
    %5 = vector.load %arg1[%c80, %c0_6] : memref<120x128xf32, #tpu.memory_space<vmem>>, vector<32x128xf32>
    %c112 = arith.constant 112 : index
    %c0_7 = arith.constant 0 : index
    %6 = vector.load %arg1[%c112, %c0_7] : memref<120x128xf32, #tpu.memory_space<vmem>>, vector<1x128xf32>
    %cst = arith.constant dense<0.000000e+00> : vector<8x128xf32>
    %7 = tpu.matmul %1, %2, %cst {dimension_numbers = #tpu.dot_dimension_numbers<[1], [0], [0], [1], [0, 0, 1, 1], [], []>} : vector<8x24xf32>, vector<24x128xf32>, vector<8x128xf32> -> vector<8x128xf32>
    %8 = math.tanh %7 : vector<8x128xf32>
    %9 = vector.extract_strided_slice %8 {offsets = [0, 0], sizes = [8, 32], strides = [1, 1]} : vector<8x128xf32> to vector<8x32xf32>
    %10 = vector.extract_strided_slice %8 {offsets = [0, 32], sizes = [8, 32], strides = [1, 1]} : vector<8x128xf32> to vector<8x32xf32>
    %cst_8 = arith.constant dense<0.000000e+00> : vector<64x128xf32>
    %11 = tpu.matmul %0, %3, %cst_8 {dimension_numbers = #tpu.dot_dimension_numbers<[1], [0], [0], [1], [0, 0, 1, 1], [], []>} : vector<64x24xf32>, vector<24x128xf32>, vector<64x128xf32> -> vector<64x128xf32>
    %12 = tpu.iota {dimensions = array<i32: 1>} : vector<8x128xi32>
    %c64_i32 = arith.constant 64 : i32
    %13 = vector.broadcast %c64_i32 : i32 to vector<8x128xi32>
    %14 = arith.cmpi sge, %12, %13 : vector<8x128xi32>
    %c96_i32 = arith.constant 96 : i32
    %15 = vector.broadcast %c96_i32 : i32 to vector<8x128xi32>
    %16 = arith.cmpi slt, %12, %15 : vector<8x128xi32>
    %17 = arith.andi %14, %16 : vector<8x128xi1>
    %cst_9 = arith.constant 1.000000e+00 : f32
    %cst_10 = arith.constant 5.000000e-01 : f32
    %18 = vector.broadcast %cst_9 : f32 to vector<8x128xf32>
    %19 = vector.broadcast %cst_10 : f32 to vector<8x128xf32>
    %20 = arith.select %17, %18, %19 : vector<8x128xi1>, vector<8x128xf32>
    %cst_11 = arith.constant 0.000000e+00 : f32
    %cst_12 = arith.constant 5.000000e-01 : f32
    %21 = vector.broadcast %cst_11 : f32 to vector<8x128xf32>
    %22 = vector.broadcast %cst_12 : f32 to vector<8x128xf32>
    %23 = arith.select %17, %21, %22 : vector<8x128xi1>, vector<8x128xf32>
    %24 = vector.extract_strided_slice %11 {offsets = [0, 0], sizes = [8, 128], strides = [1, 1]} : vector<64x128xf32> to vector<8x128xf32>
    %cst_13 = arith.constant dense<0.000000e+00> : vector<8x128xf32>
    %25 = tpu.matmul %9, %4, %cst_13 {dimension_numbers = #tpu.dot_dimension_numbers<[1], [0], [0], [1], [0, 0, 1, 1], [], []>} : vector<8x32xf32>, vector<32x128xf32>, vector<8x128xf32> -> vector<8x128xf32>
    %26 = arith.addf %24, %25 : vector<8x128xf32>
    %27 = math.tanh %26 : vector<8x128xf32>
    %28 = arith.mulf %27, %20 : vector<8x128xf32>
    %29 = arith.addf %28, %23 : vector<8x128xf32>
    %30 = vector.extract_strided_slice %29 {offsets = [0, 0], sizes = [8, 32], strides = [1, 1]} : vector<8x128xf32> to vector<8x32xf32>
    %31 = vector.extract_strided_slice %29 {offsets = [0, 32], sizes = [8, 32], strides = [1, 1]} : vector<8x128xf32> to vector<8x32xf32>
    %32 = vector.extract_strided_slice %29 {offsets = [0, 64], sizes = [8, 32], strides = [1, 1]} : vector<8x128xf32> to vector<8x32xf32>
    %33 = vector.extract_strided_slice %29 {offsets = [0, 96], sizes = [8, 32], strides = [1, 1]} : vector<8x128xf32> to vector<8x32xf32>
    %34 = arith.mulf %31, %10 : vector<8x32xf32>
    %35 = arith.mulf %30, %32 : vector<8x32xf32>
    %36 = arith.addf %34, %35 : vector<8x32xf32>
    %37 = math.tanh %36 : vector<8x32xf32>
    %38 = arith.mulf %33, %37 : vector<8x32xf32>
    %39 = vector.extract_strided_slice %11 {offsets = [8, 0], sizes = [8, 128], strides = [1, 1]} : vector<64x128xf32> to vector<8x128xf32>
    %cst_14 = arith.constant dense<0.000000e+00> : vector<8x128xf32>
    %40 = tpu.matmul %38, %4, %cst_14 {dimension_numbers = #tpu.dot_dimension_numbers<[1], [0], [0], [1], [0, 0, 1, 1], [], []>} : vector<8x32xf32>, vector<32x128xf32>, vector<8x128xf32> -> vector<8x128xf32>
    %41 = arith.addf %39, %40 : vector<8x128xf32>
    %42 = math.tanh %41 : vector<8x128xf32>
    %43 = arith.mulf %42, %20 : vector<8x128xf32>
    %44 = arith.addf %43, %23 : vector<8x128xf32>
    %45 = vector.extract_strided_slice %44 {offsets = [0, 0], sizes = [8, 32], strides = [1, 1]} : vector<8x128xf32> to vector<8x32xf32>
    %46 = vector.extract_strided_slice %44 {offsets = [0, 32], sizes = [8, 32], strides = [1, 1]} : vector<8x128xf32> to vector<8x32xf32>
    %47 = vector.extract_strided_slice %44 {offsets = [0, 64], sizes = [8, 32], strides = [1, 1]} : vector<8x128xf32> to vector<8x32xf32>
    %48 = vector.extract_strided_slice %44 {offsets = [0, 96], sizes = [8, 32], strides = [1, 1]} : vector<8x128xf32> to vector<8x32xf32>
    %49 = arith.mulf %46, %36 : vector<8x32xf32>
    %50 = arith.mulf %45, %47 : vector<8x32xf32>
    %51 = arith.addf %49, %50 : vector<8x32xf32>
    %52 = math.tanh %51 : vector<8x32xf32>
    %53 = arith.mulf %48, %52 : vector<8x32xf32>
    %54 = vector.extract_strided_slice %11 {offsets = [16, 0], sizes = [8, 128], strides = [1, 1]} : vector<64x128xf32> to vector<8x128xf32>
    %cst_15 = arith.constant dense<0.000000e+00> : vector<8x128xf32>
    %55 = tpu.matmul %53, %4, %cst_15 {dimension_numbers = #tpu.dot_dimension_numbers<[1], [0], [0], [1], [0, 0, 1, 1], [], []>} : vector<8x32xf32>, vector<32x128xf32>, vector<8x128xf32> -> vector<8x128xf32>
    %56 = arith.addf %54, %55 : vector<8x128xf32>
    %57 = math.tanh %56 : vector<8x128xf32>
    %58 = arith.mulf %57, %20 : vector<8x128xf32>
    %59 = arith.addf %58, %23 : vector<8x128xf32>
    %60 = vector.extract_strided_slice %59 {offsets = [0, 0], sizes = [8, 32], strides = [1, 1]} : vector<8x128xf32> to vector<8x32xf32>
    %61 = vector.extract_strided_slice %59 {offsets = [0, 32], sizes = [8, 32], strides = [1, 1]} : vector<8x128xf32> to vector<8x32xf32>
    %62 = vector.extract_strided_slice %59 {offsets = [0, 64], sizes = [8, 32], strides = [1, 1]} : vector<8x128xf32> to vector<8x32xf32>
    %63 = vector.extract_strided_slice %59 {offsets = [0, 96], sizes = [8, 32], strides = [1, 1]} : vector<8x128xf32> to vector<8x32xf32>
    %64 = arith.mulf %61, %51 : vector<8x32xf32>
    %65 = arith.mulf %60, %62 : vector<8x32xf32>
    %66 = arith.addf %64, %65 : vector<8x32xf32>
    %67 = math.tanh %66 : vector<8x32xf32>
    %68 = arith.mulf %63, %67 : vector<8x32xf32>
    %69 = vector.extract_strided_slice %11 {offsets = [24, 0], sizes = [8, 128], strides = [1, 1]} : vector<64x128xf32> to vector<8x128xf32>
    %cst_16 = arith.constant dense<0.000000e+00> : vector<8x128xf32>
    %70 = tpu.matmul %68, %4, %cst_16 {dimension_numbers = #tpu.dot_dimension_numbers<[1], [0], [0], [1], [0, 0, 1, 1], [], []>} : vector<8x32xf32>, vector<32x128xf32>, vector<8x128xf32> -> vector<8x128xf32>
    %71 = arith.addf %69, %70 : vector<8x128xf32>
    %72 = math.tanh %71 : vector<8x128xf32>
    %73 = arith.mulf %72, %20 : vector<8x128xf32>
    %74 = arith.addf %73, %23 : vector<8x128xf32>
    %75 = vector.extract_strided_slice %74 {offsets = [0, 0], sizes = [8, 32], strides = [1, 1]} : vector<8x128xf32> to vector<8x32xf32>
    %76 = vector.extract_strided_slice %74 {offsets = [0, 32], sizes = [8, 32], strides = [1, 1]} : vector<8x128xf32> to vector<8x32xf32>
    %77 = vector.extract_strided_slice %74 {offsets = [0, 64], sizes = [8, 32], strides = [1, 1]} : vector<8x128xf32> to vector<8x32xf32>
    %78 = vector.extract_strided_slice %74 {offsets = [0, 96], sizes = [8, 32], strides = [1, 1]} : vector<8x128xf32> to vector<8x32xf32>
    %79 = arith.mulf %76, %66 : vector<8x32xf32>
    %80 = arith.mulf %75, %77 : vector<8x32xf32>
    %81 = arith.addf %79, %80 : vector<8x32xf32>
    %82 = math.tanh %81 : vector<8x32xf32>
    %83 = arith.mulf %78, %82 : vector<8x32xf32>
    %84 = vector.extract_strided_slice %11 {offsets = [32, 0], sizes = [8, 128], strides = [1, 1]} : vector<64x128xf32> to vector<8x128xf32>
    %cst_17 = arith.constant dense<0.000000e+00> : vector<8x128xf32>
    %85 = tpu.matmul %83, %4, %cst_17 {dimension_numbers = #tpu.dot_dimension_numbers<[1], [0], [0], [1], [0, 0, 1, 1], [], []>} : vector<8x32xf32>, vector<32x128xf32>, vector<8x128xf32> -> vector<8x128xf32>
    %86 = arith.addf %84, %85 : vector<8x128xf32>
    %87 = math.tanh %86 : vector<8x128xf32>
    %88 = arith.mulf %87, %20 : vector<8x128xf32>
    %89 = arith.addf %88, %23 : vector<8x128xf32>
    %90 = vector.extract_strided_slice %89 {offsets = [0, 0], sizes = [8, 32], strides = [1, 1]} : vector<8x128xf32> to vector<8x32xf32>
    %91 = vector.extract_strided_slice %89 {offsets = [0, 32], sizes = [8, 32], strides = [1, 1]} : vector<8x128xf32> to vector<8x32xf32>
    %92 = vector.extract_strided_slice %89 {offsets = [0, 64], sizes = [8, 32], strides = [1, 1]} : vector<8x128xf32> to vector<8x32xf32>
    %93 = vector.extract_strided_slice %89 {offsets = [0, 96], sizes = [8, 32], strides = [1, 1]} : vector<8x128xf32> to vector<8x32xf32>
    %94 = arith.mulf %91, %81 : vector<8x32xf32>
    %95 = arith.mulf %90, %92 : vector<8x32xf32>
    %96 = arith.addf %94, %95 : vector<8x32xf32>
    %97 = math.tanh %96 : vector<8x32xf32>
    %98 = arith.mulf %93, %97 : vector<8x32xf32>
    %99 = vector.extract_strided_slice %11 {offsets = [40, 0], sizes = [8, 128], strides = [1, 1]} : vector<64x128xf32> to vector<8x128xf32>
    %cst_18 = arith.constant dense<0.000000e+00> : vector<8x128xf32>
    %100 = tpu.matmul %98, %4, %cst_18 {dimension_numbers = #tpu.dot_dimension_numbers<[1], [0], [0], [1], [0, 0, 1, 1], [], []>} : vector<8x32xf32>, vector<32x128xf32>, vector<8x128xf32> -> vector<8x128xf32>
    %101 = arith.addf %99, %100 : vector<8x128xf32>
    %102 = math.tanh %101 : vector<8x128xf32>
    %103 = arith.mulf %102, %20 : vector<8x128xf32>
    %104 = arith.addf %103, %23 : vector<8x128xf32>
    %105 = vector.extract_strided_slice %104 {offsets = [0, 0], sizes = [8, 32], strides = [1, 1]} : vector<8x128xf32> to vector<8x32xf32>
    %106 = vector.extract_strided_slice %104 {offsets = [0, 32], sizes = [8, 32], strides = [1, 1]} : vector<8x128xf32> to vector<8x32xf32>
    %107 = vector.extract_strided_slice %104 {offsets = [0, 64], sizes = [8, 32], strides = [1, 1]} : vector<8x128xf32> to vector<8x32xf32>
    %108 = vector.extract_strided_slice %104 {offsets = [0, 96], sizes = [8, 32], strides = [1, 1]} : vector<8x128xf32> to vector<8x32xf32>
    %109 = arith.mulf %106, %96 : vector<8x32xf32>
    %110 = arith.mulf %105, %107 : vector<8x32xf32>
    %111 = arith.addf %109, %110 : vector<8x32xf32>
    %112 = math.tanh %111 : vector<8x32xf32>
    %113 = arith.mulf %108, %112 : vector<8x32xf32>
    %114 = vector.extract_strided_slice %11 {offsets = [48, 0], sizes = [8, 128], strides = [1, 1]} : vector<64x128xf32> to vector<8x128xf32>
    %cst_19 = arith.constant dense<0.000000e+00> : vector<8x128xf32>
    %115 = tpu.matmul %113, %4, %cst_19 {dimension_numbers = #tpu.dot_dimension_numbers<[1], [0], [0], [1], [0, 0, 1, 1], [], []>} : vector<8x32xf32>, vector<32x128xf32>, vector<8x128xf32> -> vector<8x128xf32>
    %116 = arith.addf %114, %115 : vector<8x128xf32>
    %117 = math.tanh %116 : vector<8x128xf32>
    %118 = arith.mulf %117, %20 : vector<8x128xf32>
    %119 = arith.addf %118, %23 : vector<8x128xf32>
    %120 = vector.extract_strided_slice %119 {offsets = [0, 0], sizes = [8, 32], strides = [1, 1]} : vector<8x128xf32> to vector<8x32xf32>
    %121 = vector.extract_strided_slice %119 {offsets = [0, 32], sizes = [8, 32], strides = [1, 1]} : vector<8x128xf32> to vector<8x32xf32>
    %122 = vector.extract_strided_slice %119 {offsets = [0, 64], sizes = [8, 32], strides = [1, 1]} : vector<8x128xf32> to vector<8x32xf32>
    %123 = vector.extract_strided_slice %119 {offsets = [0, 96], sizes = [8, 32], strides = [1, 1]} : vector<8x128xf32> to vector<8x32xf32>
    %124 = arith.mulf %121, %111 : vector<8x32xf32>
    %125 = arith.mulf %120, %122 : vector<8x32xf32>
    %126 = arith.addf %124, %125 : vector<8x32xf32>
    %127 = math.tanh %126 : vector<8x32xf32>
    %128 = arith.mulf %123, %127 : vector<8x32xf32>
    %129 = vector.extract_strided_slice %11 {offsets = [56, 0], sizes = [8, 128], strides = [1, 1]} : vector<64x128xf32> to vector<8x128xf32>
    %cst_20 = arith.constant dense<0.000000e+00> : vector<8x128xf32>
    %130 = tpu.matmul %128, %4, %cst_20 {dimension_numbers = #tpu.dot_dimension_numbers<[1], [0], [0], [1], [0, 0, 1, 1], [], []>} : vector<8x32xf32>, vector<32x128xf32>, vector<8x128xf32> -> vector<8x128xf32>
    %131 = arith.addf %129, %130 : vector<8x128xf32>
    %132 = math.tanh %131 : vector<8x128xf32>
    %133 = arith.mulf %132, %20 : vector<8x128xf32>
    %134 = arith.addf %133, %23 : vector<8x128xf32>
    %135 = vector.extract_strided_slice %134 {offsets = [0, 0], sizes = [8, 32], strides = [1, 1]} : vector<8x128xf32> to vector<8x32xf32>
    %136 = vector.extract_strided_slice %134 {offsets = [0, 32], sizes = [8, 32], strides = [1, 1]} : vector<8x128xf32> to vector<8x32xf32>
    %137 = vector.extract_strided_slice %134 {offsets = [0, 64], sizes = [8, 32], strides = [1, 1]} : vector<8x128xf32> to vector<8x32xf32>
    %138 = vector.extract_strided_slice %134 {offsets = [0, 96], sizes = [8, 32], strides = [1, 1]} : vector<8x128xf32> to vector<8x32xf32>
    %139 = arith.mulf %136, %126 : vector<8x32xf32>
    %140 = arith.mulf %135, %137 : vector<8x32xf32>
    %141 = arith.addf %139, %140 : vector<8x32xf32>
    %142 = math.tanh %141 : vector<8x32xf32>
    %143 = arith.mulf %138, %142 : vector<8x32xf32>
    %144 = tpu.concatenate %38, %53, %68, %83, %98, %113, %128, %143 in 0 : vector<8x32xf32>, vector<8x32xf32>, vector<8x32xf32>, vector<8x32xf32>, vector<8x32xf32>, vector<8x32xf32>, vector<8x32xf32>, vector<8x32xf32> -> vector<64x32xf32>
    %cst_21 = arith.constant dense<0.000000e+00> : vector<64x128xf32>
    %145 = tpu.matmul %144, %5, %cst_21 {dimension_numbers = #tpu.dot_dimension_numbers<[1], [0], [0], [1], [0, 0, 1, 1], [], []>} : vector<64x32xf32>, vector<32x128xf32>, vector<64x128xf32> -> vector<64x128xf32>
    %146 = vector.broadcast %6 : vector<1x128xf32> to vector<64x128xf32>
    %147 = arith.addf %145, %146 : vector<64x128xf32>
    %148 = tpu.iota {dimensions = array<i32: 1>} : vector<64x128xi32>
    %c4_i32 = arith.constant 4 : i32
    %149 = vector.broadcast %c4_i32 : i32 to vector<64x128xi32>
    %150 = arith.cmpi slt, %148, %149 : vector<64x128xi32>
    %c12_i32 = arith.constant 12 : i32
    %151 = vector.broadcast %c12_i32 : i32 to vector<64x128xi32>
    %152 = arith.cmpi sge, %148, %151 : vector<64x128xi32>
    %c20_i32 = arith.constant 20 : i32
    %153 = vector.broadcast %c20_i32 : i32 to vector<64x128xi32>
    %154 = arith.cmpi slt, %148, %153 : vector<64x128xi32>
    %155 = arith.andi %152, %154 : vector<64x128xi1>
    %c20_i32_22 = arith.constant 20 : i32
    %156 = vector.broadcast %c20_i32_22 : i32 to vector<64x128xi32>
    %157 = arith.cmpi sge, %148, %156 : vector<64x128xi32>
    %c24_i32 = arith.constant 24 : i32
    %158 = vector.broadcast %c24_i32 : i32 to vector<64x128xi32>
    %159 = arith.cmpi slt, %148, %158 : vector<64x128xi32>
    %160 = arith.andi %157, %159 : vector<64x128xi1>
    %c24_i32_23 = arith.constant 24 : i32
    %161 = vector.broadcast %c24_i32_23 : i32 to vector<64x128xi32>
    %162 = arith.cmpi sge, %148, %161 : vector<64x128xi32>
    %c27_i32 = arith.constant 27 : i32
    %163 = vector.broadcast %c27_i32 : i32 to vector<64x128xi32>
    %164 = arith.cmpi slt, %148, %163 : vector<64x128xi32>
    %165 = arith.andi %162, %164 : vector<64x128xi1>
    %c27_i32_24 = arith.constant 27 : i32
    %166 = vector.broadcast %c27_i32_24 : i32 to vector<64x128xi32>
    %167 = arith.cmpi sge, %148, %166 : vector<64x128xi32>
    %cst_25 = arith.constant -1.000000e+30 : f32
    %168 = vector.broadcast %cst_25 : f32 to vector<64x128xf32>
    %169 = arith.select %150, %147, %168 : vector<64x128xi1>, vector<64x128xf32>
    %cst_26 = arith.constant dense<0xFF800000> : vector<64xf32>
    %170 = vector.multi_reduction <maximumf>, %169, %cst_26 [1] : vector<64x128xf32> to vector<64xf32>
    %171 = vector.shape_cast %170 : vector<64xf32> to vector<64x1xf32>
    %172 = vector.broadcast %171 : vector<64x1xf32> to vector<64x128xf32>
    %173 = arith.subf %169, %172 : vector<64x128xf32>
    %174 = math.exp %173 : vector<64x128xf32>
    %cst_27 = arith.constant 0.000000e+00 : f32
    %175 = vector.broadcast %cst_27 : f32 to vector<64x128xf32>
    %176 = arith.select %150, %174, %175 : vector<64x128xi1>, vector<64x128xf32>
    %cst_28 = arith.constant dense<0.000000e+00> : vector<64xf32>
    %177 = vector.multi_reduction <add>, %176, %cst_28 [1] : vector<64x128xf32> to vector<64xf32>
    %178 = vector.shape_cast %177 : vector<64xf32> to vector<64x1xf32>
    %179 = vector.broadcast %178 : vector<64x1xf32> to vector<64x128xf32>
    %180 = arith.divf %176, %179 : vector<64x128xf32>
    %cst_29 = arith.constant -1.000000e+30 : f32
    %181 = vector.broadcast %cst_29 : f32 to vector<64x128xf32>
    %182 = arith.select %165, %147, %181 : vector<64x128xi1>, vector<64x128xf32>
    %cst_30 = arith.constant dense<0xFF800000> : vector<64xf32>
    %183 = vector.multi_reduction <maximumf>, %182, %cst_30 [1] : vector<64x128xf32> to vector<64xf32>
    %184 = vector.shape_cast %183 : vector<64xf32> to vector<64x1xf32>
    %185 = vector.broadcast %184 : vector<64x1xf32> to vector<64x128xf32>
    %186 = arith.subf %182, %185 : vector<64x128xf32>
    %187 = math.exp %186 : vector<64x128xf32>
    %cst_31 = arith.constant 0.000000e+00 : f32
    %188 = vector.broadcast %cst_31 : f32 to vector<64x128xf32>
    %189 = arith.select %165, %187, %188 : vector<64x128xi1>, vector<64x128xf32>
    %cst_32 = arith.constant dense<0.000000e+00> : vector<64xf32>
    %190 = vector.multi_reduction <add>, %189, %cst_32 [1] : vector<64x128xf32> to vector<64xf32>
    %191 = vector.shape_cast %190 : vector<64xf32> to vector<64x1xf32>
    %192 = vector.broadcast %191 : vector<64x1xf32> to vector<64x128xf32>
    %193 = arith.divf %189, %192 : vector<64x128xf32>
    %194 = math.exp %147 : vector<64x128xf32>
    %195 = arith.select %155, %194, %147 : vector<64x128xi1>, vector<64x128xf32>
    %196 = math.tanh %147 : vector<64x128xf32>
    %197 = arith.select %160, %196, %195 : vector<64x128xi1>, vector<64x128xf32>
    %198 = arith.select %150, %180, %197 : vector<64x128xi1>, vector<64x128xf32>
    %199 = arith.select %165, %193, %198 : vector<64x128xi1>, vector<64x128xf32>
    %cst_33 = arith.constant 0.000000e+00 : f32
    %200 = vector.broadcast %cst_33 : f32 to vector<64x128xf32>
    %201 = arith.select %167, %200, %199 : vector<64x128xi1>, vector<64x128xf32>
    %cst_34 = arith.constant 0.000000e+00 : f32
    %202 = vector.broadcast %cst_34 : f32 to vector<8x64xf32>
    %203 = tpu.concatenate %143, %141, %202 in 1 : vector<8x32xf32>, vector<8x32xf32>, vector<8x64xf32> -> vector<8x128xf32>
    %204 = tpu.concatenate %201, %203 in 0 : vector<64x128xf32>, vector<8x128xf32> -> vector<72x128xf32>
    %c0_35 = arith.constant 0 : index
    %c0_36 = arith.constant 0 : index
    %205 = vector.load %arg2[%c0_35, %c0_36] : memref<72x128xf32, #tpu.memory_space<vmem>>, vector<72x128xf32>
    tpu.vector_store %arg2[%c0_35, %c0_36], %204 {strides = array<i32>} : memref<72x128xf32, #tpu.memory_space<vmem>>, vector<72x128xf32>,
    return
  }
}

</mosaic_0001>

<bundles_post_ra>
// kernel: decoder_forward.1
= control target key start
LH: loop header
LB: loop body
LE: loop exit
PB: predicated region body
PF: predicated region fallthrough
CT: control target
= control target key end

     0   :  { %vm35_vm0 = vcmask 195584   ;;  %vm132_vm1 = vcmask 261120   ;;  %v125_v16 = vlaneseq  ;;  %v1188_v21 = vmov 0.5   ;;  %s1189_s7 = smov 64   ;;  %s1190_s8 = smov 32   ;;  %s2048_s1 = inlined_call_operand.vmem [shape: f32[120,128], index: 1, kind: input, shape index: {}]   ;;  %s2049_s0 = inlined_call_operand.vmem [shape: f32[72,24], index: 0, kind: input, shape index: {}]   ;;  %s2050_s2 = inlined_call_operand.vmem [shape: f32[72,128], index: 2, kind: output, shape index: {}]  }
   0x1   :  { %v22_v0 = vld [vmem:[%s2048_s1 + $0x10] sm:$0xff]  ;;  %v21_v1 = vld [vmem:[%s2048_s1 + $0x8] sm:$0xff]  ;;  %v24_v3 = vld [vmem:[%s2048_s1 + $0x20] sm:$0xff]  ;;  %vm1007_vm9 = vcmask 523264  }
   0x2   :  { %52 = vmatpush.msra.mxu0 %v22_v0  ;;  %v25_v2 = vld [vmem:[%s2048_s1 + $0x28] sm:$0xff]  ;;  %v20_v4 = vld [vmem:[%s2048_s1] sm:$0xff]  ;;  %v23_v6 = vld [vmem:[%s2048_s1 + $0x18] sm:$0xff]  ;;  %v1283_v17 = vand.u32 127, %v125_v16 }
   0x3   :  { %1047 = vmatpush.msra.mxu3 %v25_v2  ;;  %97 = vmatpush.msra.mxu1 %v25_v2  ;;  %v19_v5 = vld [vmem:[%s2049_s0 + $0x40] sm:$0xff]  ;;  %v18_v7 = vld [vmem:[%s2049_s0 + $0x38] sm:$0xff]  ;;  %v1235_v8 = vld [vmem:[%s2048_s1 + $0x48] sm:$0xff] }
   0x4   :  { %53 = vmatpush.msra.mxu0 %v21_v1  ;;  %v1241_v9 = vld [vmem:[%s2048_s1 + $0x40] sm:$0xff]  ;;  %286 = vmatpush.msra.mxu2 %v1235_v8  ;;  %v1247_v10 = vld [vmem:[%s2048_s1 + $0x38] sm:$0xff]  ;;  %v1255_v11 = vld [vmem:[%s2048_s1 + $0x30] sm:$0xff]  ;;  %vm127_vm2 = vcmp.ge.s32.totalorder %v1283_v17, 64  ;;  %vm128_vm3 = vcmp.lt.s32.totalorder %v1283_v17, 96  ;;  %vm546_vm5 = vcmp.lt.s32.totalorder %v1283_v17, 4 }
   0x5   :  { %1048 = vmatpush.msra.mxu3 %v24_v3  ;;  %98 = vmatpush.msra.mxu1 %v24_v3  ;;  %v11_v12 = vld [vmem:[%s2049_s0] sm:$0xff]  ;;  %vm129_vm4 = vmand %vm127_vm2, %vm128_vm3  ;;  %v12_v35 = vld [vmem:[%s2049_s0 + $0x8] sm:$0xff]  ;;  %vm553_vm6 = vcmp.ge.s32.totalorder %v1283_v17, 24  ;;  %vm554_vm7 = vcmp.lt.s32.totalorder %v1283_v17, 27  ;;  %vm547_vm10 = vcmp.ge.s32.totalorder %v1283_v17, 12  ;;  %vm548_vm11 = vcmp.lt.s32.totalorder %v1283_v17, 20 }
   0x6   :  { %54 = vmatpush.msra.mxu0 %v20_v4  ;;  %287 = vmatpush.msra.mxu2 %v1241_v9  ;;  %v1287_v22 = vsel %vm129_vm4, 1.0, %v1188_v21  ;;  %v1289_v24 = vsel %vm129_vm4, 0.0, %v1188_v21  ;;  %v13_v51 = vld [vmem:[%s2049_s0 + $0x10] sm:$0xff]  ;;  %v14_v3 = vld [vmem:[%s2049_s0 + $0x18] sm:$0xff]  ;;  %v15_v21 = vld [vmem:[%s2049_s0 + $0x20] sm:$0xff]  ;;  %vm550_vm13 = vcmp.ge.s32.totalorder %v1283_v17, 20 }
   0x7   :  { %1022 = vmatmul.msk.f32.vlgmr.msra.gmra.mxu0 %vm35_vm0, %v19_v5  ;;  %1049 = vmatpush.msra.mxu3 %v23_v6  ;;  %vm1443_vm8 = vmand %vm553_vm6, %vm554_vm7  ;;  %vm551_vm14 = vcmp.lt.s32.totalorder %v1283_v17, 24 }
   0x8   :  { %99 = vmatpush.msra.mxu1 %v23_v6  ;;  %1030 = vmatmul.msk.f32.vlgmr.msra.gmra.mxu3 %vm35_vm0, %v18_v7  ;;  %vm1636_vm12 = vmand %vm547_vm10, %vm548_vm11 }
   0x9   :  { %148 = vmatpush.msrb.mxu3 %v1235_v8  ;;  %378 = vmatpush.msrb.mxu0 %v1235_v8  ;;  %vm1657_vm15 = vmand %vm550_vm13, %vm551_vm14  ;;  %vm556_vm14 = vcmp.ge.s32.totalorder %v1283_v17, 27 }
   0xa   :  { %288 = vmatpush.msra.mxu2 %v1247_v10  ;;  %1023 = vmatmul.msk.f32.vlgmr.msra.gmra.mxu1 %vm35_vm0, %v11_v12 }
   0xb   :  { %149 = vmatpush.msrb.mxu3 %v1241_v9  ;;  %379 = vmatpush.msrb.mxu0 %v1241_v9 }
   0xc   :  { %289 = vmatpush.msra.mxu2 %v1255_v11 }
   0xd   :  { %150 = vmatpush.msrb.mxu3 %v1247_v10  ;;  %380 = vmatpush.msrb.mxu0 %v1247_v10 }
   0xe   :  { %424 = vmatpush.msrb.mxu2 %v1235_v8 }
   0xf   :  { %151 = vmatpush.msrb.mxu3 %v1255_v11  ;;  %381 = vmatpush.msrb.mxu0 %v1255_v11 }
  0x10   :  { %425 = vmatpush.msrb.mxu2 %v1241_v9 }
  0x11   :  { %194 = vmatpush.msra.mxu3 %v1235_v8 }
  0x12   :  { %426 = vmatpush.msrb.mxu2 %v1247_v10  ;;  %1024 = vmatmul.msk.f32.gmra.mxu1 %vm35_vm0, %v12_v35 }
  0x13   :  { %195 = vmatpush.msra.mxu3 %v1241_v9 }
  0x14   :  { %427 = vmatpush.msrb.mxu2 %v1255_v11 }
  0x15   :  { %196 = vmatpush.msra.mxu3 %v1247_v10 }
  0x17   :  { %197 = vmatpush.msra.mxu3 %v1255_v11 }
  0x1a   :  { %1025 = vmatmul.msk.f32.gmra.mxu1 %vm35_vm0, %v13_v51 }
  0x22   :  { %1026 = vmatmul.msk.f32.gmra.mxu1 %vm35_vm0, %v14_v3 }
  0x2a   :  { %1027 = vmatmul.msk.f32.gmra.mxu1 %vm35_vm0, %v15_v21 }
  0x84   :  { %v56_v13 = vpop.f32.mrf.mxu0 }
  0x85   :  { %1058 = vtanh.f32 %v56_v13 }
  0x87   :  { %v101_v18 = vpop.f32.mrf.mxu1 }
  0x8b   :  { %v1059_v14 = vpop.eup %1058  ;;  %v1281_v15 = vpop.f32.mrf.mxu3 }
  0x8c   :  { %1031 = vmatmul.msk.f32.vlgmr.msrb.gmra.mxu3 %vm132_vm1, %v1059_v14 }
  0x8d   :  { %240 = vmatpush.msrb.mxu3 %v1235_v8 }
  0x8f   :  { %241 = vmatpush.msrb.mxu3 %v1241_v9  ;;  %v104_v37 = vpop.f32.mrf.mxu1 }
  0x91   :  { %242 = vmatpush.msrb.mxu3 %v1247_v10 }
  0x93   :  { %243 = vmatpush.msrb.mxu3 %v1255_v11 }
  0x97   :  { %v107_v53 = vpop.f32.mrf.mxu1 }
  0x9f   :  { %v110_v5 = vpop.f32.mrf.mxu1 }
 0x10f   :  { %v153_v19 = vpop.f32.mrf.mxu3 }
 0x110   :  { %v156_v20 = vadd.f32 %v153_v19, %v101_v18 }
 0x112   :  { %1060 = vtanh.f32 %v156_v20 }
 0x118   :  { %v1061_v23 = vpop.eup %1060 }
 0x119   :  { %v158_v25 = vmul.f32 %v1061_v23, %v1287_v22 }
 0x11b   :  { %v159_v26 = vadd.f32 %v158_v25, %v1289_v24  ;;  %v113_v25 = vpop.f32.mrf.mxu1 }
 0x11d   :  { %162 = vrot.lane.b32.xlu0 %v159_v26, %s1189_s7  ;;  %v160_v29 = vmul.f32 %v1059_v14, %v159_v26 }
 0x18f   :  { %v163_v27 = vpop.permute.xlu0 %162 }
 0x190   :  { %v165_v28 = vmul.f32 %v163_v27, %v159_v26 }
 0x192   :  { %167 = vrot.lane.b32.xlu0 %v165_v28, %s1190_s8 }
 0x204   :  { %v168_v30 = vpop.permute.xlu0 %167 }
 0x205   :  { %v170_v31 = vadd.f32 %v168_v30, %v160_v29 }
 0x207   :  { %1062 = vtanh.f32 %v170_v31 }
 0x20d   :  { %v1063_v32 = vpop.eup %1062 }
 0x20e   :  { %173 = vrot.lane.b32.xlu1 %v1063_v32, %s1189_s7 }
 0x280   :  { %v174_v33 = vpop.permute.xlu1 %173 }
 0x281   :  { %v176_v34 = vmul.f32 %v174_v33, %v159_v26 }
 0x283   :  { %178 = vrot.lane.b32.xlu1 %v176_v34, %s1190_s8 }
 0x2f5   :  { %v1301_v36 = vpop.permute.xlu1 %178 }
 0x2f6   :  { %1032 = vmatmul.msk.f32.vlgmr.msra.gmra.mxu3 %vm132_vm1, %v1301_v36 }
 0x2f7   :  { %332 = vmatpush.msra.mxu3 %v1235_v8 }
 0x2f9   :  { %333 = vmatpush.msra.mxu3 %v1241_v9 }
 0x2fb   :  { %334 = vmatpush.msra.mxu3 %v1247_v10 }
 0x2fd   :  { %335 = vmatpush.msra.mxu3 %v1255_v11 }
 0x379   :  { %v199_v38 = vpop.f32.mrf.mxu3 }
 0x37a   :  { %v202_v39 = vadd.f32 %v199_v38, %v104_v37 }
 0x37c   :  { %1064 = vtanh.f32 %v202_v39 }
 0x382   :  { %v1065_v40 = vpop.eup %1064 }
 0x383   :  { %v204_v41 = vmul.f32 %v1065_v40, %v1287_v22  ;;  %v16_v40 = vld [vmem:[%s2049_s0 + $0x28] sm:$0xff] }
 0x384   :  { %1028 = vmatmul.msk.f32.gmra.mxu1 %vm35_vm0, %v16_v40 }
 0x385   :  { %v205_v42 = vadd.f32 %v204_v41, %v1289_v24  ;;  %v33_v41 = vld [vmem:[%s2048_s1 + $0x68] sm:$0xff] }
 0x386   :  { %517 = vmatpush.msra.mxu0 %v33_v41 }
 0x387   :  { %208 = vrot.lane.b32.xlu2 %v205_v42, %s1189_s7  ;;  %v206_v45 = vmul.f32 %v205_v42, %v170_v31 }
 0x3e1   :  { %v209_v43 = vpop.permute.xlu2 %208 }
 0x3e2   :  { %v211_v44 = vmul.f32 %v209_v43, %v205_v42  ;;  %v31_v43 = vld [vmem:[%s2048_s1 + $0x58] sm:$0xff] }
 0x3e4   :  { %213 = vrot.lane.b32.xlu2 %v211_v44, %s1190_s8  ;;  %v30_v44 = vld [vmem:[%s2048_s1 + $0x50] sm:$0xff] }
 0x43e   :  { %v214_v46 = vpop.permute.xlu2 %213 }
 0x43f   :  { %v216_v47 = vadd.f32 %v214_v46, %v206_v45  ;;  %v116_v46 = vpop.f32.mrf.mxu1 }
 0x441   :  { %1066 = vtanh.f32 %v216_v47 }
 0x447   :  { %v1067_v48 = vpop.eup %1066 }
 0x448   :  { %219 = vrot.lane.b32.xlu0 %v1067_v48, %s1189_s7 }
 0x4ba   :  { %v220_v49 = vpop.permute.xlu0 %219 }
 0x4bb   :  { %v222_v50 = vmul.f32 %v220_v49, %v205_v42  ;;  %v32_v42 = vld [vmem:[%s2048_s1 + $0x60] sm:$0xff] }
 0x4bc   :  { %518 = vmatpush.msra.mxu0 %v32_v42 }
 0x4bd   :  { %224 = vrot.lane.b32.xlu1 %v222_v50, %s1190_s8 }
 0x4be   :  { %519 = vmatpush.msra.mxu0 %v31_v43 }
 0x4c0   :  { %520 = vmatpush.msra.mxu0 %v30_v44 }
 0x52f   :  { %v1319_v52 = vpop.permute.xlu1 %224 }
 0x530   :  { %1033 = vmatmul.msk.f32.vlgmr.msrb.gmra.mxu3 %vm132_vm1, %v1319_v52 }
 0x531   :  { %470 = vmatpush.msrb.mxu3 %v1235_v8 }
 0x533   :  { %471 = vmatpush.msrb.mxu3 %v1241_v9 }
 0x535   :  { %472 = vmatpush.msrb.mxu3 %v1247_v10 }
 0x537   :  { %473 = vmatpush.msrb.mxu3 %v1255_v11 }
 0x5b3   :  { %v245_v54 = vpop.f32.mrf.mxu3 }
 0x5b4   :  { %v248_v55 = vadd.f32 %v245_v54, %v107_v53 }
 0x5b6   :  { %1068 = vtanh.f32 %v248_v55 }
 0x5bc   :  { %v1069_v56 = vpop.eup %1068 }
 0x5bd   :  { %v250_v57 = vmul.f32 %v1069_v56, %v1287_v22 }
 0x5bf   :  { %v251_v58 = vadd.f32 %v250_v57, %v1289_v24 }
 0x5c1   :  { %254 = vrot.lane.b32.xlu2 %v251_v58, %s1189_s7  ;;  %v252_v61 = vmul.f32 %v251_v58, %v216_v47 }
 0x61b   :  { %v255_v59 = vpop.permute.xlu2 %254 }
 0x61c   :  { %v257_v60 = vmul.f32 %v255_v59, %v251_v58  ;;  %v17_v59 = vld [vmem:[%s2049_s0 + $0x30] sm:$0xff] }
 0x61d   :  { %1029 = vmatmul.msk.f32.gmra.mxu1 %vm35_vm0, %v17_v59 }
 0x61e   :  { %259 = vrot.lane.b32.xlu0 %v257_v60, %s1190_s8 }
 0x690   :  { %v260_v62 = vpop.permute.xlu0 %259 }
 0x691   :  { %v262_v63 = vadd.f32 %v260_v62, %v252_v61 }
 0x693   :  { %1070 = vtanh.f32 %v262_v63 }
 0x699   :  { %v1071_v0 = vpop.eup %1070 }
 0x69a   :  { %265 = vrot.lane.b32.xlu1 %v1071_v0, %s1189_s7  ;;  %v119_v61 = vpop.f32.mrf.mxu1 }
 0x70c   :  { %v266_v1 = vpop.permute.xlu1 %265 }
 0x70d   :  { %v268_v2 = vmul.f32 %v266_v1, %v251_v58 }
 0x70f   :  { %270 = vrot.lane.b32.xlu2 %v268_v2, %s1190_s8 }
 0x769   :  { %v1337_v4 = vpop.permute.xlu2 %270 }
 0x76a   :  { %1034 = vmatmul.msk.f32.vlgmr.msra.gmra.mxu2 %vm132_vm1, %v1337_v4 }
 0x76b   :  { %1050 = vmatpush.msra.mxu2 %v33_v41 }
 0x76d   :  { %1051 = vmatpush.msra.mxu2 %v32_v42 }
 0x76f   :  { %1052 = vmatpush.msra.mxu2 %v31_v43 }
 0x771   :  { %1053 = vmatpush.msra.mxu2 %v30_v44 }
 0x7ed   :  { %v291_v6 = vpop.f32.mrf.mxu2 }
 0x7ee   :  { %v294_v7 = vadd.f32 %v291_v6, %v110_v5 }
 0x7f0   :  { %1072 = vtanh.f32 %v294_v7 }
 0x7f6   :  { %v1073_v8 = vpop.eup %1072 }
 0x7f7   :  { %v296_v9 = vmul.f32 %v1073_v8, %v1287_v22 }
 0x7f9   :  { %v297_v10 = vadd.f32 %v296_v9, %v1289_v24 }
 0x7fb   :  { %300 = vrot.lane.b32.xlu0 %v297_v10, %s1189_s7  ;;  %v298_v13 = vmul.f32 %v297_v10, %v262_v63 }
 0x86d   :  { %v301_v11 = vpop.permute.xlu0 %300 }
 0x86e   :  { %v303_v12 = vmul.f32 %v301_v11, %v297_v10 }
 0x870   :  { %305 = vrot.lane.b32.xlu1 %v303_v12, %s1190_s8 }
 0x8e2   :  { %v306_v14 = vpop.permute.xlu1 %305 }
 0x8e3   :  { %v308_v16 = vadd.f32 %v306_v14, %v298_v13 }
 0x8e5   :  { %1074 = vtanh.f32 %v308_v16 }
 0x8eb   :  { %v1075_v18 = vpop.eup %1074 }
 0x8ec   :  { %311 = vrot.lane.b32.xlu2 %v1075_v18, %s1189_s7 }
 0x946   :  { %v312_v19 = vpop.permute.xlu2 %311 }
 0x947   :  { %v314_v20 = vmul.f32 %v312_v19, %v297_v10 }
 0x949   :  { %316 = vrot.lane.b32.xlu0 %v314_v20, %s1190_s8 }
 0x9bb   :  { %v317_v23 = vpop.permute.xlu0 %316 }
 0x9bc   :  { %1035 = vmatmul.msk.f32.vlgmr.msra.gmra.mxu3 %vm132_vm1, %v317_v23 }
 0xa3f   :  { %v337_v26 = vpop.f32.mrf.mxu3 }
 0xa40   :  { %v340_v27 = vadd.f32 %v337_v26, %v113_v25  ;;  %v1411_v26 = vld [vmem:[%s2048_s1 + $0x70] ss:$0 sm:$0xff] }
 0xa42   :  { %1076 = vtanh.f32 %v340_v27 }
 0xa48   :  { %v1077_v28 = vpop.eup %1076 }
 0xa49   :  { %v342_v29 = vmul.f32 %v1077_v28, %v1287_v22 }
 0xa4b   :  { %v343_v30 = vadd.f32 %v342_v29, %v1289_v24 }
 0xa4d   :  { %346 = vrot.lane.b32.xlu1 %v343_v30, %s1189_s7  ;;  %v344_v33 = vmul.f32 %v343_v30, %v308_v16 }
 0xabf   :  { %v347_v31 = vpop.permute.xlu1 %346 }
 0xac0   :  { %v349_v32 = vmul.f32 %v347_v31, %v343_v30 }
 0xac2   :  { %351 = vrot.lane.b32.xlu2 %v349_v32, %s1190_s8 }
 0xb1c   :  { %v352_v34 = vpop.permute.xlu2 %351 }
 0xb1d   :  { %v354_v35 = vadd.f32 %v352_v34, %v344_v33 }
 0xb1f   :  { %1078 = vtanh.f32 %v354_v35 }
 0xb25   :  { %v1079_v37 = vpop.eup %1078 }
 0xb26   :  { %357 = vrot.lane.b32.xlu0 %v1079_v37, %s1189_s7 }
 0xb98   :  { %v358_v38 = vpop.permute.xlu0 %357 }
 0xb99   :  { %v360_v39 = vmul.f32 %v358_v38, %v343_v30 }
 0xb9b   :  { %362 = vrot.lane.b32.xlu1 %v360_v39, %s1190_s8 }
 0xc0d   :  { %v363_v45 = vpop.permute.xlu1 %362 }
 0xc0e   :  { %1036 = vmatmul.msk.f32.vlgmr.msrb.gmra.mxu0 %vm132_vm1, %v363_v45 }
 0xc16   :  { %1039 = vmatmul.msk.f32.vlgmr.msra.gmra.mxu0 %vm132_vm1, %v1301_v36 }
 0xc1e   :  { %1040 = vmatmul.msk.f32.gmra.mxu0 %vm132_vm1, %v1319_v52 }
 0xc26   :  { %1041 = vmatmul.msk.f32.gmra.mxu0 %vm132_vm1, %v1337_v4 }
 0xc2e   :  { %1042 = vmatmul.msk.f32.gmra.mxu0 %vm132_vm1, %v317_v23 }
 0xc8b   :  { %v383_v47 = vpop.f32.mrf.mxu0 }
 0xc8c   :  { %v386_v48 = vadd.f32 %v383_v47, %v116_v46 }
 0xc8e   :  { %1080 = vtanh.f32 %v386_v48 }
 0xc93   :  { %v522_v21 = vpop.f32.mrf.mxu0 }
 0xc94   :  { %v1081_v49 = vpop.eup %1080 }
 0xc95   :  { %v388_v50 = vmul.f32 %v1081_v49, %v1287_v22 }
 0xc97   :  { %v389_v51 = vadd.f32 %v388_v50, %v1289_v24 }
 0xc99   :  { %392 = vrot.lane.b32.xlu2 %v389_v51, %s1189_s7  ;;  %v390_v52 = vmul.f32 %v389_v51, %v354_v35 }
 0xc9b   :  { %v525_v23 = vpop.f32.mrf.mxu0 }
 0xc9c   :  { %v1452_v40 = vadd.f32 %v1411_v26, %v525_v23 }
 0xc9e   :  { %v558_v41 = vsel %vm546_vm5, %v1452_v40, -1e+30 }
 0xca3   :  { %v528_v25 = vpop.f32.mrf.mxu0 }
 0xca4   :  { %v1439_v32 = vadd.f32 %v1411_v26, %v528_v25 }
 0xca6   :  { %v751_v34 = vsel %vm1443_vm8, %v1439_v32, -1e+30 }
 0xcf3   :  { %v393_v36 = vpop.permute.xlu2 %392 }
 0xcf4   :  { %v395_v53 = vmul.f32 %v393_v36, %v389_v51 }
 0xcf6   :  { %397 = vrot.lane.b32.xlu0 %v395_v53, %s1190_s8 }
 0xd68   :  { %v398_v54 = vpop.permute.xlu0 %397 }
 0xd69   :  { %v400_v55 = vadd.f32 %v398_v54, %v390_v52 }
 0xd6b   :  { %1082 = vtanh.f32 %v400_v55 }
 0xd71   :  { %v1083_v56 = vpop.eup %1082 }
 0xd72   :  { %403 = vrot.lane.b32.xlu1 %v1083_v56, %s1189_s7  ;;  %v559_v56 = vsel %vm546_vm5, %v1439_v32, -1e+30 }
 0xde4   :  { %v404_v57 = vpop.permute.xlu1 %403 }
 0xde5   :  { %v406_v58 = vmul.f32 %v404_v57, %v389_v51 }
 0xde7   :  { %408 = vrot.lane.b32.xlu2 %v406_v58, %s1190_s8 }
 0xe41   :  { %v409_v60 = vpop.permute.xlu2 %408 }
 0xe42   :  { %1037 = vmatmul.msk.f32.vlgmr.msrb.gmra.mxu2 %vm132_vm1, %v409_v60 }
 0xe4a   :  { %1043 = vmatmul.msk.f32.vlgmr.msra.gmra.mxu2 %vm132_vm1, %v363_v45 }
 0xe52   :  { %1044 = vmatmul.msk.f32.gmra.mxu2 %vm132_vm1, %v409_v60 }
 0xec5   :  { %v429_v62 = vpop.f32.mrf.mxu2 }
 0xec6   :  { %v432_v63 = vadd.f32 %v429_v62, %v119_v61 }
 0xec8   :  { %1084 = vtanh.f32 %v432_v63 }
 0xecd   :  { %v534_v29 = vpop.f32.mrf.mxu2 }
 0xece   :  { %v1085_v0 = vpop.eup %1084  ;;  %v1433_v30 = vadd.f32 %v1411_v26, %v534_v29 }
 0xecf   :  { %v434_v1 = vmul.f32 %v1085_v0, %v1287_v22 }
 0xed0   :  { %v561_v31 = vsel %vm546_vm5, %v1433_v30, -1e+30 }
 0xed1   :  { %v435_v2 = vadd.f32 %v434_v1, %v1289_v24 }
 0xed3   :  { %438 = vrot.lane.b32.xlu0 %v435_v2, %s1189_s7  ;;  %v436_v5 = vmul.f32 %v435_v2, %v400_v55 }
 0xed5   :  { %v537_v42 = vpop.f32.mrf.mxu2 }
 0xed6   :  { %v1458_v43 = vadd.f32 %v1411_v26, %v537_v42 }
 0xed8   :  { %v1463_v44 = vsel %vm546_vm5, %v1458_v43, -1e+30 }
 0xf45   :  { %v439_v3 = vpop.permute.xlu0 %438 }
 0xf46   :  { %v441_v4 = vmul.f32 %v439_v3, %v435_v2  ;;  %v1507_v3 = vsel %vm1443_vm8, %v1452_v40, -1e+30 }
 0xf48   :  { %443 = vrot.lane.b32.xlu1 %v441_v4, %s1190_s8 }
 0xfba   :  { %v444_v6 = vpop.permute.xlu1 %443 }
 0xfbb   :  { %v446_v7 = vadd.f32 %v444_v6, %v436_v5  ;;  %v1518_v6 = vsel %vm1443_vm8, %v1433_v30, -1e+30 }
 0xfbd   :  { %1086 = vtanh.f32 %v446_v7 }
 0xfc3   :  { %v1087_v8 = vpop.eup %1086 }
 0xfc4   :  { %449 = vrot.lane.b32.xlu2 %v1087_v8, %s1189_s7 }
0x101e   :  { %v450_v9 = vpop.permute.xlu2 %449 }
0x101f   :  { %v452_v10 = vmul.f32 %v450_v9, %v435_v2 }
0x1021   :  { %454 = vrot.lane.b32.xlu0 %v452_v10, %s1190_s8 }
0x1093   :  { %v455_v11 = vpop.permute.xlu0 %454 }
0x1094   :  { %1038 = vmatmul.msk.f32.vlgmr.msrb.gmra.mxu3 %vm132_vm1, %v455_v11  ;;  %1045 = vmatmul.msk.f32.gmra.mxu2 %vm132_vm1, %v455_v11 }
0x1117   :  { %v475_v12 = vpop.f32.mrf.mxu3  ;;  %v540_v47 = vpop.f32.mrf.mxu2 }
0x1118   :  { %v478_v13 = vadd.f32 %v475_v12, %v1281_v15  ;;  %v1414_v15 = vadd.f32 %v1411_v26, %v522_v21  ;;  %v1479_v48 = vadd.f32 %v1411_v26, %v540_v47 }
0x111a   :  { %1088 = vtanh.f32 %v478_v13  ;;  %v1469_v45 = vsel %vm1443_vm8, %v1414_v15, -1e+30  ;;  %v1484_v49 = vsel %vm1443_vm8, %v1479_v48, -1e+30  ;;  %v1496_v61 = vsel %vm546_vm5, %v1479_v48, -1e+30 }
0x1120   :  { %v1089_v14 = vpop.eup %1088 }
0x1121   :  { %v480_v16 = vmul.f32 %v1089_v14, %v1287_v22  ;;  %v1420_v22 = vsel %vm546_vm5, %v1414_v15, -1e+30 }
0x1123   :  { %v481_v18 = vadd.f32 %v480_v16, %v1289_v24  ;;  %v531_v24 = vpop.f32.mrf.mxu0 }
0x1124   :  { %v1424_v27 = vadd.f32 %v1411_v26, %v531_v24 }
0x1125   :  { %484 = vrot.lane.b32.xlu1 %v481_v18, %s1189_s7  ;;  %v482_v35 = vmul.f32 %v481_v18, %v446_v7 }
0x1126   :  { %v1429_v28 = vsel %vm546_vm5, %v1424_v27, -1e+30  ;;  %v1475_v46 = vsel %vm1443_vm8, %v1424_v27, -1e+30 }
0x1197   :  { %v485_v19 = vpop.permute.xlu1 %484 }
0x1198   :  { %v487_v20 = vmul.f32 %v485_v19, %v481_v18 }
0x119a   :  { %489 = vrot.lane.b32.xlu2 %v487_v20, %s1190_s8 }
0x11c3   :  { %565 = vmax.xlane.f32.xlu2 %v1420_v22 }
0x11cb   :  { %571 = vmax.xlane.f32.xlu2 %v1429_v28 }
0x11d3   :  { %573 = vmax.xlane.f32.xlu2 %v561_v31 }
0x11db   :  { %761 = vmax.xlane.f32.xlu2 %v751_v34 }
0x11f4   :  { %v490_v37 = vpop.permute.xlu2 %489 }
0x11f5   :  { %v492_v38 = vadd.f32 %v490_v37, %v482_v35  ;;  %v1554_v35 = vsel %vm1443_vm8, %v1458_v43, -1e+30 }
0x11f7   :  { %1090 = vtanh.f32 %v492_v38 }
0x11fd   :  { %v1091_v39 = vpop.eup %1090 }
0x11fe   :  { %495 = vrot.lane.b32.xlu0 %v1091_v39, %s1189_s7 }
0x1228   :  { %567 = vmax.xlane.f32.xlu0 %v558_v41 }
0x1230   :  { %575 = vmax.xlane.f32.xlu0 %v1463_v44 }
0x1236   :  { %v566_v36 = vpop.xlane.xlu2 %565 }
0x1238   :  { %757 = vmax.xlane.f32.xlu0 %v1469_v45 }
0x123e   :  { %v1488_v53 = vpop.xlane.xlu2 %571 }
0x123f   :  { %v584_v29 = vsub.f32 %v1429_v28, %v1488_v53 }
0x1240   :  { %763 = vmax.xlane.f32.xlu0 %v1475_v46 }
0x1241   :  { %v595_v39 = vmul.f32 1.442695, %v584_v29 }
0x1246   :  { %v574_v52 = vpop.xlane.xlu2 %573 }
0x1247   :  { %v585_v57 = vsub.f32 %v561_v31, %v574_v52 }
0x1248   :  { %769 = vmax.xlane.f32.xlu0 %v1484_v49 }
0x1249   :  { %v597_v59 = vmul.f32 1.442695, %v585_v57 }
0x124e   :  { %v762_v60 = vpop.xlane.xlu2 %761 }
0x124f   :  { %v775_v63 = vsub.f32 %v751_v34, %v762_v60 }
0x1251   :  { %v785_v1 = vmul.f32 1.442695, %v775_v63 }
0x1270   :  { %v496_v50 = vpop.permute.xlu0 %495 }
0x1271   :  { %v498_v51 = vmul.f32 %v496_v50, %v481_v18  ;;  %v581_v18 = vsub.f32 %v1420_v22, %v566_v36 }
0x1273   :  { %501 = vrot.lane.b32.xlu1 %v498_v51, %s1190_s8 }
0x129b   :  { %v568_v54 = vpop.xlane.xlu0 %567 }
0x129c   :  { %v582_v55 = vsub.f32 %v558_v41, %v568_v54 }
0x129d   :  { %569 = vmax.xlane.f32.xlu1 %v559_v56 }
0x129e   :  { %v591_v58 = vmul.f32 1.442695, %v582_v55 }
0x12a0   :  { %1092 = vpow2.f32 %v591_v58 }
0x12a1   :  { %1094 = vpow2.f32 %v597_v59 }
0x12a2   :  { %1096 = vpow2.f32 %v785_v1 }
0x12a3   :  { %v576_v12 = vpop.xlane.xlu0 %575 }
0x12a4   :  { %v586_v20 = vsub.f32 %v1463_v44, %v576_v12 }
0x12a5   :  { %577 = vmax.xlane.f32.xlu1 %v1496_v61 }
0x12a6   :  { %v1093_v62 = vpop.eup %1092  ;;  %v599_v22 = vmul.f32 1.442695, %v586_v20  ;;  %v945_v20 = vmul.f32 1.442695, %v1439_v32 }
0x12a7   :  { %v1501_v0 = vsel %vm546_vm5, %v1093_v62, 0.0  ;;  %v1095_v2 = vpop.eup %1094 }
0x12a8   :  { %615 = vadd.xlane.f32.xlu0 %v1501_v0  ;;  %v1512_v4 = vsel %vm546_vm5, %v1095_v2, 0.0  ;;  %v1097_v5 = vpop.eup %1096 }
0x12a9   :  { %v1523_v7 = vsel %vm1443_vm8, %v1097_v5, 0.0 }
0x12ab   :  { %v758_v21 = vpop.xlane.xlu0 %757 }
0x12ac   :  { %v773_v31 = vsub.f32 %v1469_v45, %v758_v21  ;;  %v947_v21 = vmul.f32 1.442695, %v1424_v27 }
0x12ad   :  { %759 = vmax.xlane.f32.xlu1 %v1507_v3 }
0x12ae   :  { %v781_v28 = vmul.f32 1.442695, %v773_v31 }
0x12b0   :  { %621 = vadd.xlane.f32.xlu0 %v1512_v4 }
0x12b5   :  { %765 = vmax.xlane.f32.xlu1 %v1518_v6 }
0x12b8   :  { %809 = vadd.xlane.f32.xlu0 %v1523_v7 }
0x12e5   :  { %v502_v8 = vpop.permute.xlu1 %501 }
0x12e6   :  { %v1006_v9 = vsel %vm132_vm1, %v502_v8, %v492_v38  ;;  %1046 = vmatmul.msk.f32.gmra.mxu2 %vm132_vm1, %v502_v8  ;;  %v764_v38 = vpop.xlane.xlu0 %763 }
0x12e7   :  { %v1008_v10 = vsel %vm1007_vm9, %v1006_v9, 0.0  ;;  %v776_v44 = vsub.f32 %v1475_v46, %v764_v38 }
0x12e8   :  { %1017 = vst [vmem:[%s2050_s2 + $0x40] sm:$0xff] %v1008_v10 }
0x12e9   :  { %v787_v51 = vmul.f32 1.442695, %v776_v44 }
0x12ee   :  { %v770_v53 = vpop.xlane.xlu0 %769 }
0x12ef   :  { %v779_v55 = vsub.f32 %v1484_v49, %v770_v53 }
0x12f1   :  { %v793_v59 = vmul.f32 1.442695, %v779_v55 }
0x1310   :  { %v570_v11 = vpop.xlane.xlu1 %569 }
0x1311   :  { %v583_v13 = vsub.f32 %v559_v56, %v570_v11 }
0x1313   :  { %v593_v14 = vmul.f32 1.442695, %v583_v13 }
0x1315   :  { %1098 = vpow2.f32 %v593_v14 }
0x1318   :  { %v578_v34 = vpop.xlane.xlu1 %577 }
0x1319   :  { %v587_v45 = vsub.f32 %v1496_v61, %v578_v34 }
0x131b   :  { %v1099_v24 = vpop.eup %1098  ;;  %v601_v52 = vmul.f32 1.442695, %v587_v45  ;;  %v1612_v12 = vpop.xlane.xlu0 %615 }
0x131c   :  { %v1558_v37 = vsel %vm546_vm5, %v1099_v24, 0.0  ;;  %vm649_vm6 = vweird.f32 %v1612_v12 }
0x1320   :  { %v760_v36 = vpop.xlane.xlu1 %759 }
0x1321   :  { %v774_v56 = vsub.f32 %v1507_v3, %v760_v36  ;;  %v953_v36 = vmul.f32 1.442695, %v1479_v48 }
0x1323   :  { %v783_v60 = vmul.f32 1.442695, %v774_v56  ;;  %v1614_v13 = vpop.xlane.xlu0 %621 }
0x1328   :  { %v766_v62 = vpop.xlane.xlu1 %765 }
0x1329   :  { %v777_v63 = vsub.f32 %v1518_v6, %v766_v62 }
0x132b   :  { %v789_v3 = vmul.f32 1.442695, %v777_v63  ;;  %v1616_v14 = vpop.xlane.xlu0 %809 }
0x132c   :  { %vm856_vm1 = vweird.f32 %v1616_v14 }
0x1369   :  { %v543_v16 = vpop.f32.mrf.mxu2 }
0x136a   :  { %v1533_v19 = vadd.f32 %v1411_v26, %v543_v16  ;;  %v589_v26 = vmul.f32 1.442695, %v581_v18  ;;  %v941_v16 = vmul.f32 1.442695, %v1414_v15  ;;  %v943_v18 = vmul.f32 1.442695, %v1452_v40 }
0x136c   :  { %v1539_v23 = vsel %vm1443_vm8, %v1533_v19, -1e+30  ;;  %v1544_v25 = vsel %vm546_vm5, %v1533_v19, -1e+30  ;;  %1100 = vpow2.f32 %v589_v26  ;;  %v951_v26 = vmul.f32 1.442695, %v1458_v43 }
0x136d   :  { %771 = vmax.xlane.f32.xlu1 %v1539_v23  ;;  %579 = vmax.xlane.f32.xlu2 %v1544_v25  ;;  %1102 = vpow2.f32 %v599_v22 }
0x136e   :  { %1104 = vpow2.f32 %v595_v39 }
0x136f   :  { %1106 = vpow2.f32 %v781_v28 }
0x1370   :  { %1108 = vpow2.f32 %v787_v51 }
0x1371   :  { %1110 = vpow2.f32 %v601_v52 }
0x1372   :  { %v1101_v41 = vpop.eup %1100  ;;  %1112 = vpow2.f32 %v793_v59 }
0x1373   :  { %v1103_v42 = vpop.eup %1102  ;;  %v1566_v47 = vsel %vm546_vm5, %v1101_v41, 0.0  ;;  %1114 = vpow2.f32 %v783_v60 }
0x1374   :  { %v1570_v50 = vsel %vm546_vm5, %v1103_v42, 0.0  ;;  %v1105_v46 = vpop.eup %1104  ;;  %1116 = vpow2.f32 %v789_v3 }
0x1375   :  { %767 = vmax.xlane.f32.xlu2 %v1554_v35  ;;  %617 = vadd.xlane.f32.xlu1 %v1558_v37  ;;  %v1107_v54 = vpop.eup %1106  ;;  %v1578_v57 = vsel %vm546_vm5, %v1105_v46, 0.0  ;;  %1118 = vrcp.f32 %v1616_v14 }
0x1376   :  { %v1582_v58 = vsel %vm1443_vm8, %v1107_v54, 0.0  ;;  %v1109_v61 = vpop.eup %1108  ;;  %1120 = vtanh.f32 %v1414_v15 }
0x1377   :  { %v1111_v49 = vpop.eup %1110  ;;  %v1593_v2 = vsel %vm1443_vm8, %v1109_v61, 0.0  ;;  %1122 = vpow2.f32 %v941_v16  ;;  %v949_v61 = vmul.f32 1.442695, %v1433_v30 }
0x1378   :  { %v1589_v1 = vsel %vm546_vm5, %v1111_v49, 0.0  ;;  %v1113_v5 = vpop.eup %1112  ;;  %1124 = vtanh.f32 %v1452_v40 }
0x1379   :  { %v1115_v8 = vpop.eup %1114  ;;  %v1603_v6 = vsel %vm1443_vm8, %v1113_v5, 0.0  ;;  %1126 = vpow2.f32 %v943_v18 }
0x137a   :  { %v1599_v9 = vsel %vm1443_vm8, %v1115_v8, 0.0  ;;  %v1117_v10 = vpop.eup %1116  ;;  %1128 = vpow2.f32 %v945_v20 }
0x137b   :  { %v1609_v11 = vsel %vm1443_vm8, %v1117_v10, 0.0  ;;  %v1628_v34 = vpop.eup %1118  ;;  %1130 = vpow2.f32 %v947_v21 }
0x137c   :  { %v1121_v38 = vpop.eup %1120  ;;  %1132 = vpow2.f32 %v951_v26  ;;  %vm857_vm0 = vweird.f32 %v1628_v34 }
0x137d   :  { %613 = vadd.xlane.f32.xlu2 %v1566_v47  ;;  %623 = vadd.xlane.f32.xlu1 %v1570_v50  ;;  %v1123_v41 = vpop.eup %1122  ;;  %1134 = vrcp.f32 %v1612_v12  ;;  %vm1726_vm2 = vmor %vm856_vm1, %vm857_vm0 }
0x137e   :  { %v1125_v42 = vpop.eup %1124  ;;  %v957_v60 = vsel %vm1636_vm12, %v1123_v41, %v1414_v15 }
0x137f   :  { %v1689_v20 = vsel %vm1657_vm15, %v1121_v38, %v957_v60 }
0x1385   :  { %619 = vadd.xlane.f32.xlu2 %v1578_v57  ;;  %805 = vadd.xlane.f32.xlu1 %v1582_v58 }
0x138d   :  { %625 = vadd.xlane.f32.xlu2 %v1589_v1  ;;  %811 = vadd.xlane.f32.xlu1 %v1593_v2 }
0x1395   :  { %807 = vadd.xlane.f32.xlu2 %v1599_v9  ;;  %817 = vadd.xlane.f32.xlu1 %v1603_v6 }
0x139d   :  { %813 = vadd.xlane.f32.xlu2 %v1609_v11 }
0x13e0   :  { %v580_v22 = vpop.xlane.xlu2 %579  ;;  %v772_v24 = vpop.xlane.xlu1 %771 }
0x13e1   :  { %v588_v29 = vsub.f32 %v1544_v25, %v580_v22  ;;  %v780_v31 = vsub.f32 %v1539_v23, %v772_v24  ;;  %v852_v25 = vmul.f32 %v1628_v34, %v1616_v14  ;;  %v1127_v23 = vpop.eup %1126 }
0x13e2   :  { %v1129_v44 = vpop.eup %1128 }
0x13e3   :  { %v603_v39 = vmul.f32 1.442695, %v588_v29  ;;  %v795_v28 = vmul.f32 1.442695, %v780_v31  ;;  %v1131_v45 = vpop.eup %1130  ;;  %v853_v54 = vsub.f32 1.0, %v852_v25  ;;  %v959_v3 = vsel %vm1636_vm12, %v1129_v44, %v1439_v32 }
0x13e4   :  { %v1133_v46 = vpop.eup %1132  ;;  %v960_v8 = vsel %vm1636_vm12, %v1131_v45, %v1424_v27  ;;  %v655_v44 = vand.u32 2147483648, %v1612_v12  ;;  %v860_v45 = vand.u32 2147483647, %v1616_v14 }
0x13e5   :  { %1136 = vpow2.f32 %v603_v39  ;;  %v1648_v56 = vpop.eup %1134  ;;  %v854_v10 = vmul.f32 %v1628_v34, %v853_v54  ;;  %v962_v16 = vsel %vm1636_vm12, %v1133_v46, %v1458_v43 }
0x13e6   :  { %1138 = vpow2.f32 %v795_v28  ;;  %v645_v18 = vmul.f32 %v1648_v56, %v1612_v12  ;;  %vm861_vm7 = vcmp.eq.f32.partialorder %v860_v45, 8.507059e+37  ;;  %vm650_vm11 = vweird.f32 %v1648_v56 }
0x13e7   :  { %1140 = vtanh.f32 %v1439_v32  ;;  %v855_v39 = vadd.f32 %v1628_v34, %v854_v10  ;;  %v656_v10 = vor.u32 1.1754944e-38, %v655_v44  ;;  %vm1787_vm0 = vmor %vm649_vm6, %vm650_vm11 }
0x13e8   :  { %1142 = vtanh.f32 %v1424_v27  ;;  %v768_v53 = vpop.xlane.xlu2 %767  ;;  %v1643_v52 = vpop.xlane.xlu1 %617  ;;  %v646_v41 = vsub.f32 1.0, %v645_v18 }
0x13e9   :  { %v778_v55 = vsub.f32 %v1554_v35, %v768_v53  ;;  %1144 = vrcp.f32 %v1643_v52  ;;  %v958_v35 = vsel %vm1636_vm12, %v1127_v23, %v1452_v40  ;;  %vm664_vm4 = vweird.f32 %v1643_v52 }
0x13ea   :  { %1146 = vtanh.f32 %v1458_v43  ;;  %v1693_v21 = vsel %vm1657_vm15, %v1125_v42, %v958_v35  ;;  %v862_v42 = vand.u32 2147483648, %v1616_v14  ;;  %v647_v35 = vmul.f32 %v1648_v56, %v646_v41 }
0x13eb   :  { %v1137_v59 = vpop.eup %1136  ;;  %v791_v62 = vmul.f32 1.442695, %v778_v55  ;;  %1148 = vpow2.f32 %v953_v36  ;;  %v670_v36 = vand.u32 2147483648, %v1643_v52  ;;  %v668_v55 = vand.u32 2147483647, %v1643_v52 }
0x13ec   :  { %v1139_v49 = vpop.eup %1138  ;;  %v1669_v15 = vsel %vm546_vm5, %v1137_v59, 0.0 }
0x13ed   :  { %v1141_v5 = vpop.eup %1140  ;;  %1150 = vpow2.f32 %v791_v62  ;;  %v1677_v40 = vsel %vm1443_vm8, %v1139_v49, 0.0  ;;  %627 = vadd.xlane.f32.xlu0 %v1669_v15  ;;  %v859_v62 = vsel %vm1726_vm2, %v1628_v34, %v855_v39  ;;  %vm669_vm10 = vcmp.eq.f32.partialorder %v668_v55, 8.507059e+37 }
0x13ee   :  { %v1143_v32 = vpop.eup %1142  ;;  %1152 = vtanh.f32 %v1433_v30  ;;  %819 = vadd.xlane.f32.xlu2 %v1677_v40  ;;  %v1697_v22 = vsel %vm1657_vm15, %v1141_v5, %v959_v3  ;;  %v863_v3 = vor.u32 1.1754944e-38, %v862_v42  ;;  %v648_v42 = vadd.f32 %v1648_v56, %v647_v35 }
0x13ef   :  { %v1145_v27 = vpop.eup %1144  ;;  %1154 = vpow2.f32 %v949_v61  ;;  %v1701_v43 = vsel %vm1657_vm15, %v1143_v32, %v960_v8  ;;  %v653_v61 = vand.u32 2147483647, %v1612_v12  ;;  %v671_v32 = vor.u32 1.1754944e-38, %v670_v36 }
0x13f0   :  { %v1147_v26 = vpop.eup %1146  ;;  %1156 = vrcp.f32 %v1614_v13  ;;  %v660_v24 = vmul.f32 %v1145_v27, %v1643_v52  ;;  %v1705_v29 = vpop.xlane.xlu2 %613  ;;  %vm665_vm3 = vweird.f32 %v1145_v27 }
0x13f1   :  { %v1707_v31 = vpop.xlane.xlu1 %623  ;;  %v1711_v38 = vsel %vm1657_vm15, %v1147_v26, %v962_v16  ;;  %1158 = vrcp.f32 %v1705_v29  ;;  %v1716_v28 = vpop.eup %1148  ;;  %vm666_vm9 = vmor %vm664_vm4, %vm665_vm3  ;;  %v864_v16 = vsel %vm861_vm7, %v863_v3, %v859_v62  ;;  %vm1765_vm13 = vcmp.eq.f32.partialorder %v653_v61, 8.507059e+37 }
0x13f2   :  { %v661_v25 = vsub.f32 1.0, %v660_v24  ;;  %1160 = vrcp.f32 %v1707_v31  ;;  %v963_v14 = vsel %vm1636_vm12, %v1716_v28, %v1479_v48  ;;  %v865_v36 = vmul.f32 %v864_v16, %v1523_v7 }
0x13f3   :  { %v1151_v23 = vpop.eup %1150  ;;  %1162 = vtanh.f32 %v1479_v48  ;;  %v713_v3 = vand.u32 2147483647, %v1707_v31  ;;  %vm709_vm3 = vweird.f32 %v1707_v31  ;;  %vm634_vm4 = vweird.f32 %v1705_v29 }
0x13f4   :  { %v1724_v53 = vpop.eup %1152  ;;  %v662_v54 = vmul.f32 %v1145_v27, %v661_v25  ;;  %v1733_v59 = vsel %vm1443_vm8, %v1151_v23, 0.0 }
0x13f5   :  { %v1735_v60 = vpop.eup %1154  ;;  %815 = vadd.xlane.f32.xlu0 %v1733_v59  ;;  %vm714_vm7 = vcmp.eq.f32.partialorder %v713_v3, 8.507059e+37 }
0x13f6   :  { %v1747_v49 = vpop.eup %1156  ;;  %v663_v5 = vadd.f32 %v1145_v27, %v662_v54  ;;  %v698_v54 = vand.u32 2147483647, %v1614_v13 }
0x13f7   :  { %v1751_v8 = vpop.eup %1158 }
0x13f8   :  { %v1161_v34 = vpop.eup %1160  ;;  %v667_v18 = vsel %vm666_vm9, %v1145_v27, %v663_v5  ;;  %v630_v26 = vmul.f32 %v1751_v8, %v1705_v29  ;;  %v1757_v24 = vpop.xlane.xlu2 %619  ;;  %v690_v27 = vmul.f32 %v1747_v49, %v1614_v13  ;;  %vm635_vm2 = vweird.f32 %v1751_v8 }
0x13f9   :  { %v1759_v39 = vpop.xlane.xlu1 %805  ;;  %v672_v52 = vsel %vm669_vm10, %v671_v32, %v667_v18  ;;  %v705_v41 = vmul.f32 %v1161_v34, %v1707_v31  ;;  %1164 = vrcp.f32 %v1757_v24  ;;  %v1772_v45 = vpop.eup %1162  ;;  %vm710_vm1 = vweird.f32 %v1161_v34  ;;  %vm1822_vm9 = vmor %vm634_vm4, %vm635_vm2 }
0x13fa   :  { %v673_v23 = vmul.f32 %v672_v52, %v1558_v37  ;;  %v631_v44 = vsub.f32 1.0, %v630_v26  ;;  %1166 = vrcp.f32 %v1759_v39  ;;  %v715_v37 = vand.u32 2147483648, %v1707_v31  ;;  %vm711_vm6 = vmor %vm709_vm3, %vm710_vm1 }
0x13fb   :  { %v706_v46 = vsub.f32 1.0, %v705_v41  ;;  %v691_v5 = vsub.f32 1.0, %v690_v27  ;;  %v700_v32 = vand.u32 2147483648, %v1614_v13  ;;  %vm695_vm10 = vweird.f32 %v1747_v49 }
0x13fc   :  { %v983_v55 = vsel %vm546_vm5, %v673_v23, %v1697_v22  ;;  %v632_v61 = vmul.f32 %v1751_v8, %v631_v44  ;;  %v652_v22 = vsel %vm1787_vm0, %v1648_v56, %v648_v42  ;;  %v640_v56 = vand.u32 2147483648, %v1705_v29 }
0x13fd   :  { %v991_v62 = vsel %vm1443_vm8, %v865_v36, %v983_v55  ;;  %v707_v35 = vmul.f32 %v1161_v34, %v706_v46  ;;  %v716_v52 = vor.u32 1.1754944e-38, %v715_v37  ;;  %v638_v44 = vand.u32 2147483647, %v1705_v29 }
0x13fe   :  { %v999_v12 = vsel %vm556_vm14, 0.0, %v991_v62  ;;  %v633_v18 = vadd.f32 %v1751_v8, %v632_v61  ;;  %v1818_v31 = vor.u32 1.1754944e-38, %v700_v32  ;;  %v657_v7 = vsel %vm1765_vm13, %v656_v10, %v652_v22 }
0x13ff   :  { %v1800_v16 = vpop.eup %1164  ;;  %1011 = vst [vmem:[%s2050_s2 + $0x10] sm:$0xff] %v999_v12  ;;  %v708_v26 = vadd.f32 %v1161_v34, %v707_v35  ;;  %v692_v29 = vmul.f32 %v1747_v49, %v691_v5  ;;  %v641_v35 = vor.u32 1.1754944e-38, %v640_v56  ;;  %vm639_vm11 = vcmp.eq.f32.partialorder %v638_v44, 8.507059e+37 }
0x1400   :  { %v675_v41 = vmul.f32 %v1800_v16, %v1757_v24  ;;  %v1812_v42 = vpop.xlane.xlu2 %625  ;;  %v1167_v23 = vpop.eup %1166  ;;  %v683_v25 = vand.u32 2147483647, %v1757_v24  ;;  %v830_v10 = vand.u32 2147483647, %v1759_v39  ;;  %v832_v22 = vand.u32 2147483648, %v1759_v39 }
0x1401   :  { %v1814_v27 = vpop.xlane.xlu1 %811  ;;  %v712_v36 = vsel %vm711_vm6, %v1161_v34, %v708_v26  ;;  %1168 = vrcp.f32 %v1812_v42  ;;  %v822_v37 = vmul.f32 %v1167_v23, %v1759_v39  ;;  %v637_v34 = vsel %vm1822_vm9, %v1751_v8, %v633_v18 }
0x1402   :  { %v717_v55 = vsel %vm714_vm7, %v716_v52, %v712_v36  ;;  %v676_v61 = vsub.f32 1.0, %v675_v41  ;;  %1170 = vrcp.f32 %v1814_v27  ;;  %vm694_vm13 = vweird.f32 %v1614_v13 }
0x1403   :  { %v718_v62 = vmul.f32 %v717_v55, %v1570_v50  ;;  %v823_v32 = vsub.f32 1.0, %v822_v37  ;;  %v642_v8 = vsel %vm639_vm11, %v641_v35, %v637_v34  ;;  %vm827_vm0 = vweird.f32 %v1167_v23 }
0x1404   :  { %v677_v3 = vmul.f32 %v1800_v16, %v676_v61  ;;  %v1849_v18 = vmul.f32 %v657_v7, %v1501_v0  ;;  %vm680_vm1 = vweird.f32 %v1800_v16  ;;  %v685_v56 = vand.u32 2147483648, %v1757_v24 }
0x1405   :  { %v824_v5 = vmul.f32 %v1167_v23, %v823_v32  ;;  %v1844_v50 = vsel %vm546_vm5, %v718_v62, %v1711_v38  ;;  %v1855_v52 = vadd.f32 %v1747_v49, %v692_v29  ;;  %vm826_vm2 = vweird.f32 %v1759_v39 }
0x1406   :  { %v678_v26 = vadd.f32 %v1800_v16, %v677_v3  ;;  %v643_v0 = vmul.f32 %v642_v8, %v1566_v47  ;;  %vm679_vm3 = vweird.f32 %v1757_v24  ;;  %vm828_vm4 = vmor %vm826_vm2, %vm827_vm0  ;;  %v833_v36 = vor.u32 1.1754944e-38, %v832_v22 }
0x1407   :  { %v1846_v12 = vpop.eup %1168  ;;  %v825_v41 = vadd.f32 %v1167_v23, %v824_v5  ;;  %vm1865_vm6 = vmor %vm679_vm3, %vm680_vm1  ;;  %vm1869_vm7 = vcmp.eq.f32.partialorder %v683_v25, 8.507059e+37  ;;  %vm831_vm9 = vcmp.eq.f32.partialorder %v830_v10, 8.507059e+37  ;;  %v686_v24 = vor.u32 1.1754944e-38, %v685_v56 }
0x1408   :  { %v720_v38 = vmul.f32 %v1846_v12, %v1812_v42  ;;  %v1860_v44 = vpop.xlane.xlu2 %807  ;;  %v1171_v46 = vpop.eup %1170  ;;  %v682_v47 = vsel %vm1865_vm6, %v1800_v16, %v678_v26  ;;  %v728_v3 = vand.u32 2147483647, %v1812_v42  ;;  %v981_v32 = vsel %vm546_vm5, %v643_v0, %v1689_v20  ;;  %vm1898_vm0 = vmor %vm694_vm13, %vm695_vm10 }
0x1409   :  { %1172 = vrcp.f32 %v1860_v44  ;;  %v829_v61 = vsel %vm828_vm4, %v1167_v23, %v825_v41  ;;  %v1873_v7 = vpop.xlane.xlu1 %817  ;;  %v867_v34 = vmul.f32 %v1171_v46, %v1814_v27  ;;  %v730_v23 = vand.u32 2147483648, %v1812_v42 }
0x140a   :  { %v721_v37 = vsub.f32 1.0, %v720_v38  ;;  %v834_v29 = vsel %vm831_vm9, %v833_v36, %v829_v61  ;;  %v875_v10 = vand.u32 2147483647, %v1814_v27  ;;  %1174 = vrcp.f32 %v1873_v7 }
0x140b   :  { %v835_v62 = vmul.f32 %v834_v29, %v1582_v58  ;;  %v868_v25 = vsub.f32 1.0, %v867_v34  ;;  %v687_v16 = vsel %vm1869_vm7, %v686_v24, %v682_v47  ;;  %vm725_vm11 = vweird.f32 %v1846_v12 }
0x140c   :  { %v722_v35 = vmul.f32 %v1846_v12, %v721_v37  ;;  %v877_v22 = vand.u32 2147483648, %v1814_v27  ;;  %vm872_vm1 = vweird.f32 %v1171_v46  ;;  %v697_v41 = vsel %vm1898_vm0, %v1747_v49, %v1855_v52 }
0x140d   :  { %v989_v58 = vsel %vm1443_vm8, %v835_v62, %v981_v32  ;;  %v869_v56 = vmul.f32 %v1171_v46, %v868_v25  ;;  %vm1911_vm2 = vcmp.eq.f32.partialorder %v698_v54, 8.507059e+37  ;;  %vm724_vm10 = vweird.f32 %v1812_v42 }
0x140e   :  { %v997_v5 = vsel %vm556_vm14, 0.0, %v989_v58  ;;  %v723_v26 = vadd.f32 %v1846_v12, %v722_v35  ;;  %vm871_vm13 = vweird.f32 %v1814_v27  ;;  %v688_v49 = vmul.f32 %v687_v16, %v1578_v57  ;;  %vm1926_vm3 = vmor %vm724_vm10, %vm725_vm11 }
0x140f   :  { %v1173_v8 = vpop.eup %1172  ;;  %1009 = vst [vmem:[%s2050_s2] sm:$0xff] %v997_v5  ;;  %v870_v54 = vadd.f32 %v1171_v46, %v869_v56  ;;  %v845_v52 = vand.u32 2147483647, %v1860_v44  ;;  %vm1932_vm4 = vcmp.eq.f32.partialorder %v728_v3, 8.507059e+37  ;;  %vm873_vm6 = vmor %vm871_vm13, %vm872_vm1  ;;  %v878_v27 = vor.u32 1.1754944e-38, %v877_v22 }
0x1410   :  { %v837_v0 = vmul.f32 %v1173_v8, %v1860_v44  ;;  %v1921_v36 = vpop.xlane.xlu2 %813  ;;  %v847_v57 = vand.u32 2147483648, %v1860_v44  ;;  %v1175_v39 = vpop.eup %1174  ;;  %v727_v61 = vsel %vm1926_vm3, %v1846_v12, %v723_v26  ;;  %v731_v37 = vor.u32 1.1754944e-38, %v730_v23 }
0x1411   :  { %1176 = vrcp.f32 %v1921_v36  ;;  %v874_v47 = vsel %vm873_vm6, %v1171_v46, %v870_v54  ;;  %vm876_vm7 = vcmp.eq.f32.partialorder %v875_v10, 8.507059e+37  ;;  %vm842_vm9 = vweird.f32 %v1173_v8 }
0x1412   :  { %v838_v55 = vsub.f32 1.0, %v837_v0  ;;  %v879_v24 = vsel %vm876_vm7, %v878_v27, %v874_v47  ;;  %v912_v34 = vmul.f32 %v1175_v39, %v1873_v7  ;;  %v984_v62 = vsel %vm546_vm5, %v688_v49, %v1701_v43 }
0x1413   :  { %v880_v35 = vmul.f32 %v879_v24, %v1593_v2  ;;  %vm841_vm11 = vweird.f32 %v1860_v44  ;;  %vm1946_vm0 = vcmp.eq.f32.partialorder %v845_v52, 8.507059e+37  ;;  %v848_v46 = vor.u32 1.1754944e-38, %v847_v57 }
0x1414   :  { %v839_v29 = vmul.f32 %v1173_v8, %v838_v55  ;;  %v913_v23 = vsub.f32 1.0, %v912_v34  ;;  %v920_v32 = vand.u32 2147483647, %v1873_v7  ;;  %v732_v10 = vsel %vm1932_vm4, %v731_v37, %v727_v61  ;;  %vm843_vm1 = vmor %vm841_vm11, %vm842_vm9 }
0x1415   :  { %v992_v43 = vsel %vm1443_vm8, %v880_v35, %v984_v62  ;;  %vm917_vm10 = vweird.f32 %v1175_v39  ;;  %v922_v2 = vand.u32 2147483648, %v1873_v7  ;;  %v982_v20 = vsel %vm546_vm5, %v1849_v18, %v1693_v21 }
0x1416   :  { %v840_v12 = vadd.f32 %v1173_v8, %v839_v29  ;;  %v1000_v44 = vsel %vm556_vm14, 0.0, %v992_v43  ;;  %v914_v58 = vmul.f32 %v1175_v39, %v913_v23  ;;  %v702_v5 = vsel %vm1911_vm2, %v1818_v31, %v697_v41 }
0x1417   :  { %v1177_v25 = vpop.eup %1176  ;;  %1012 = vst [vmem:[%s2050_s2 + $0x18] sm:$0xff] %v1000_v44  ;;  %vm916_vm13 = vweird.f32 %v1873_v7  ;;  %vm921_vm3 = vcmp.eq.f32.partialorder %v920_v32, 8.507059e+37  ;;  %v733_v21 = vmul.f32 %v732_v10, %v1589_v1  ;;  %v923_v18 = vor.u32 1.1754944e-38, %v922_v2 }
0x1418   :  { %v844_v16 = vsel %vm843_vm1, %v1173_v8, %v840_v12  ;;  %v882_v22 = vmul.f32 %v1177_v25, %v1921_v36  ;;  %v915_v56 = vadd.f32 %v1175_v39, %v914_v58  ;;  %vm918_vm4 = vmor %vm916_vm13, %vm917_vm10  ;;  %v890_v31 = vand.u32 2147483647, %v1921_v36 }
0x1419   :  { %v849_v26 = vsel %vm1946_vm0, %v848_v46, %v844_v16  ;;  %v892_v41 = vand.u32 2147483648, %v1921_v36  ;;  %vm887_vm2 = vweird.f32 %v1177_v25  ;;  %v979_v1 = vsel %vm1657_vm15, %v1772_v45, %v963_v14 }
0x141a   :  { %v850_v8 = vmul.f32 %v849_v26, %v1599_v9  ;;  %v883_v0 = vsub.f32 1.0, %v882_v22  ;;  %v919_v49 = vsel %vm918_vm4, %v1175_v39, %v915_v56  ;;  %vm886_vm6 = vweird.f32 %v1921_v36 }
0x141b   :  { %v924_v7 = vsel %vm921_vm3, %v923_v18, %v919_v49  ;;  %v961_v42 = vsel %vm1636_vm12, %v1735_v60, %v1433_v30  ;;  %v703_v48 = vmul.f32 %v702_v5, %v1512_v4  ;;  %v987_v28 = vsel %vm546_vm5, %v733_v21, %v979_v1  ;;  %vm888_vm7 = vmor %vm886_vm6, %vm887_vm2 }
0x141c   :  { %v990_v38 = vsel %vm1443_vm8, %v850_v8, %v982_v20  ;;  %v884_v13 = vmul.f32 %v1177_v25, %v883_v0  ;;  %v925_v54 = vmul.f32 %v924_v7, %v1603_v6  ;;  %v893_v14 = vor.u32 1.1754944e-38, %v892_v41 }
0x141d   :  { %v998_v9 = vsel %vm556_vm14, 0.0, %v990_v38  ;;  %vm891_vm9 = vcmp.eq.f32.partialorder %v890_v31, 8.507059e+37  ;;  %v977_v30 = vsel %vm1657_vm15, %v1724_v53, %v961_v42  ;;  %v955_v61 = vmul.f32 1.442695, %v1533_v19 }
0x141e   :  { %1010 = vst [vmem:[%s2050_s2 + $0x8] sm:$0xff] %v998_v9  ;;  %v885_v52 = vadd.f32 %v1177_v25, %v884_v13  ;;  %v995_v45 = vsel %vm1443_vm8, %v925_v54, %v987_v28  ;;  %v985_v60 = vsel %vm546_vm5, %v703_v48, %v977_v30 }
0x141f   :  { %v1003_v6 = vsel %vm556_vm14, 0.0, %v995_v45 }
0x1420   :  { %v889_v27 = vsel %vm888_vm7, %v1177_v25, %v885_v52  ;;  %1015 = vst [vmem:[%s2050_s2 + $0x30] sm:$0xff] %v1003_v6 }
0x1421   :  { %v894_v36 = vsel %vm891_vm9, %v893_v14, %v889_v27 }
0x1422   :  { %v895_v4 = vmul.f32 %v894_v36, %v1609_v11 }
0x1424   :  { %v993_v55 = vsel %vm1443_vm8, %v895_v4, %v985_v60 }
0x1425   :  { %v1001_v57 = vsel %vm556_vm14, 0.0, %v993_v55 }
0x1426   :  { %1013 = vst [vmem:[%s2050_s2 + $0x20] sm:$0xff] %v1001_v57 }
0x1460   :  { %v628_v53 = vpop.xlane.xlu0 %627 }
0x1461   :  { %v820_v39 = vpop.xlane.xlu2 %819  ;;  %1178 = vrcp.f32 %v628_v53  ;;  %v745_v35 = vand.u32 2147483648, %v628_v53  ;;  %v743_v23 = vand.u32 2147483647, %v628_v53  ;;  %vm739_vm1 = vweird.f32 %v628_v53 }
0x1462   :  { %1180 = vrcp.f32 %v820_v39  ;;  %v937_v12 = vand.u32 2147483648, %v820_v39  ;;  %v935_v25 = vand.u32 2147483647, %v820_v39  ;;  %vm931_vm10 = vweird.f32 %v820_v39 }
0x1463   :  { %1182 = vpow2.f32 %v955_v61  ;;  %v746_v16 = vor.u32 1.1754944e-38, %v745_v35  ;;  %vm744_vm4 = vcmp.eq.f32.partialorder %v743_v23, 8.507059e+37 }
0x1464   :  { %v938_v58 = vor.u32 1.1754944e-38, %v937_v12  ;;  %vm936_vm2 = vcmp.eq.f32.partialorder %v935_v25, 8.507059e+37 }
0x1467   :  { %v1179_v11 = vpop.eup %1178 }
0x1468   :  { %v1181_v37 = vpop.eup %1180  ;;  %v735_v47 = vmul.f32 %v1179_v11, %v628_v53  ;;  %v816_v24 = vpop.xlane.xlu0 %815  ;;  %vm740_vm11 = vweird.f32 %v1179_v11 }
0x1469   :  { %v927_v29 = vmul.f32 %v1181_v37, %v820_v39  ;;  %1184 = vrcp.f32 %v816_v24  ;;  %v1183_v3 = vpop.eup %1182  ;;  %vm932_vm0 = vweird.f32 %v1181_v37  ;;  %vm741_vm13 = vmor %vm739_vm1, %vm740_vm11  ;;  %v907_v18 = vand.u32 2147483648, %v816_v24 }
0x146a   :  { %v736_v34 = vsub.f32 1.0, %v735_v47  ;;  %1186 = vtanh.f32 %v1533_v19  ;;  %v964_v2 = vsel %vm1636_vm12, %v1183_v3, %v1533_v19  ;;  %vm933_vm3 = vmor %vm931_vm10, %vm932_vm0  ;;  %v905_v38 = vand.u32 2147483647, %v816_v24 }
0x146b   :  { %v928_v62 = vsub.f32 1.0, %v927_v29  ;;  %vm901_vm6 = vweird.f32 %v816_v24  ;;  %v908_v63 = vor.u32 1.1754944e-38, %v907_v18 }
0x146c   :  { %v737_v46 = vmul.f32 %v1179_v11, %v736_v34  ;;  %vm906_vm7 = vcmp.eq.f32.partialorder %v905_v38, 8.507059e+37 }
0x146d   :  { %v929_v32 = vmul.f32 %v1181_v37, %v928_v62 }
0x146e   :  { %v738_v10 = vadd.f32 %v1179_v11, %v737_v46 }
0x146f   :  { %v1185_v43 = vpop.eup %1184  ;;  %v930_v44 = vadd.f32 %v1181_v37, %v929_v32 }
0x1470   :  { %v742_v22 = vsel %vm741_vm13, %v1179_v11, %v738_v10  ;;  %v897_v20 = vmul.f32 %v1185_v43, %v816_v24  ;;  %v1187_v5 = vpop.eup %1186  ;;  %vm902_vm12 = vweird.f32 %v1185_v43 }
0x1471   :  { %v934_v26 = vsel %vm933_vm3, %v1181_v37, %v930_v44  ;;  %v747_v8 = vsel %vm744_vm4, %v746_v16, %v742_v22  ;;  %v980_v19 = vsel %vm1657_vm15, %v1187_v5, %v964_v2  ;;  %vm903_vm15 = vmor %vm901_vm6, %vm902_vm12 }
0x1472   :  { %v939_v56 = vsel %vm936_vm2, %v938_v58, %v934_v26  ;;  %v748_v0 = vmul.f32 %v747_v8, %v1669_v15  ;;  %v898_v21 = vsub.f32 1.0, %v897_v20 }
0x1473   :  { %v940_v51 = vmul.f32 %v939_v56, %v1677_v40 }
0x1474   :  { %v988_v31 = vsel %vm546_vm5, %v748_v0, %v980_v19  ;;  %v899_v41 = vmul.f32 %v1185_v43, %v898_v21 }
0x1475   :  { %v996_v49 = vsel %vm1443_vm8, %v940_v51, %v988_v31 }
0x1476   :  { %v1004_v13 = vsel %vm556_vm14, 0.0, %v996_v49  ;;  %v900_v15 = vadd.f32 %v1185_v43, %v899_v41 }
0x1477   :  { %1016 = vst [vmem:[%s2050_s2 + $0x38] sm:$0xff] %v1004_v13 }
0x1478   :  { %v904_v40 = vsel %vm903_vm15, %v1185_v43, %v900_v15 }
0x1479   :  { %v909_v9 = vsel %vm906_vm7, %v908_v63, %v904_v40 }
0x147a   :  { %v910_v7 = vmul.f32 %v909_v9, %v1733_v59 }
0x147c   :  { %v994_v1 = vsel %vm1443_vm8, %v910_v7, %v1844_v50 }
0x147d   :  { %v1002_v54 = vsel %vm556_vm14, 0.0, %v994_v1 }
0x147e   :  { %1014 = vst [vmem:[%s2050_s2 + $0x28] sm:$0xff] %v1002_v54 }

</bundles_post_ra>
